<compile_context>
chip_gen: v7x
topology: tpu7x:2x2x1
jax: 0.10.0
libtpu: 0.0.40
codegen_flags: <defaults>
</compile_context>

<pallas_src>
import functools

import jax
import jax.numpy as jnp
from jax.experimental import pallas as pl
from jax.experimental.pallas import tpu as pltpu

LANE = 128                         # channel / K dims padded to this once, at init
_VMEM_LIMIT = 32 * 1024 * 1024     # explicit scoped-VMEM budget (safe on v5e/v6e/v7x)


def _rup(x, m):
    return ((x + m - 1) // m) * m


def _pick_tile(dim, cap, align):
    """Largest tile <= cap that is a multiple of `align` and divides `dim`.
    Falls back to the full dim (block == full array dim is always legal)."""
    t = (cap // align) * align
    while t >= align:
        if dim % t == 0:
            return t
        t -= align
    return dim


# ---------------------------------------------------------------------------
# Pallas kernels
# ---------------------------------------------------------------------------
def _mm_bn_act_kernel(x_ref, w_ref, ss_ref, o_ref, acc_ref, *, apply_act):
    """act((X @ W) * scale + shift); X/W bf16 on the MXU, f32 accumulator."""
    k = pl.program_id(2)

    @pl.when(k == 0)
    def _():
        acc_ref[...] = jnp.zeros_like(acc_ref)

    acc_ref[...] += jnp.dot(x_ref[...], w_ref[...],
                            preferred_element_type=jnp.float32)

    @pl.when(k == pl.num_programs(2) - 1)
    def _():
        y = acc_ref[...] * ss_ref[0:1, :] + ss_ref[1:2, :]
        if apply_act:
            y = jnp.where(y > 0, y, 0.1 * y)     # LeakyReLU(0.1)
        o_ref[...] = y.astype(o_ref.dtype)


def _mm_bn_act_fused2_kernel(x_ref, w1_ref, ss1_ref, w2_ref, ss2_ref,
                             o1_ref, o2_ref, acc_ref, *, act1, act2):
    """Same as above, plus a fused second 1x1 conv (matmul on the resident
    accumulator tile) in the epilogue. Requires N1 to be a single block."""
    k = pl.program_id(1)

    @pl.when(k == 0)
    def _():
        acc_ref[...] = jnp.zeros_like(acc_ref)

    acc_ref[...] += jnp.dot(x_ref[...], w1_ref[...],
                            preferred_element_type=jnp.float32)

    @pl.when(k == pl.num_programs(1) - 1)
    def _():
        y1 = acc_ref[...] * ss1_ref[0:1, :] + ss1_ref[1:2, :]
        if act1:
            y1 = jnp.where(y1 > 0, y1, 0.1 * y1)
        o1_ref[...] = y1.astype(o1_ref.dtype)
        y2 = jnp.dot(y1.astype(jnp.bfloat16), w2_ref[...],
                     preferred_element_type=jnp.float32)
        y2 = y2 * ss2_ref[0:1, :] + ss2_ref[1:2, :]
        if act2:
            y2 = jnp.where(y2 > 0, y2, 0.1 * y2)
        o2_ref[...] = y2.astype(o2_ref.dtype)


# ---------------------------------------------------------------------------
# pallas_call wrappers (operands arrive already lane-padded; no per-call padding)
# ---------------------------------------------------------------------------
def matmul_bn_act(x, w, ss, *, apply_act=True, out_dtype=jnp.bfloat16,
                  tm_cap=256, tn_cap=256, tk_cap=512):
    M, K = x.shape
    K2, N = w.shape
    assert K == K2 and ss.shape == (2, N), (x.shape, w.shape, ss.shape)

    Mp = _rup(M, 8)
    if Mp != M:                                  # static; no-op at the shapes used here
        x = jnp.pad(x, ((0, Mp - M), (0, 0)))
    tm = _pick_tile(Mp, tm_cap, 8)
    tn = _pick_tile(N, tn_cap, LANE)
    tk = _pick_tile(K, tk_cap, LANE)
    # v7x has two TensorCores: ensure a "parallel" axis has >= 2 blocks.
    if (Mp // tm) * (N // tn) == 1 and tm % 16 == 0:
        tm //= 2

    kernel = functools.partial(_mm_bn_act_kernel, apply_act=apply_act)
    out = pl.pallas_call(
        kernel,
        out_shape=jax.ShapeDtypeStruct((Mp, N), out_dtype),
        grid_spec=pltpu.PrefetchScalarGridSpec(
            num_scalar_prefetch=0,
            grid=(Mp // tm, N // tn, K // tk),
            in_specs=[
                pl.BlockSpec((tm, tk), lambda i, j, k: (i, k)),
                pl.BlockSpec((tk, tn), lambda i, j, k: (k, j)),
                pl.BlockSpec((2, tn), lambda i, j, k: (0, j)),
            ],
            out_specs=pl.BlockSpec((tm, tn), lambda i, j, k: (i, j)),
            scratch_shapes=[pltpu.VMEM((tm, tn), jnp.float32)],
        ),
        compiler_params=pltpu.CompilerParams(
            dimension_semantics=("parallel", "parallel", "arbitrary"),
            vmem_limit_bytes=_VMEM_LIMIT),
    )(x, w, ss)
    return out if Mp == M else out[:M]


def matmul_bn_act_fused2(x, w1, ss1, w2, ss2, *, act1=True, act2=True,
                         out1_dtype=jnp.bfloat16, out2_dtype=jnp.bfloat16,
                         tm_cap=256, tk_cap=512):
    M, K = x.shape
    K2, N1 = w1.shape
    N1b, N2 = w2.shape
    assert K == K2 and N1 == N1b and ss1.shape == (2, N1) and ss2.shape == (2, N2)

    Mp = _rup(M, 8)
    if Mp != M:
        x = jnp.pad(x, ((0, Mp - M), (0, 0)))
    tm = _pick_tile(Mp, tm_cap, 8)
    tk = _pick_tile(K, tk_cap, LANE)
    if Mp // tm == 1 and tm % 16 == 0:          # feed both v7x TensorCores
        tm //= 2

    kernel = functools.partial(_mm_bn_act_fused2_kernel, act1=act1, act2=act2)
    o1, o2 = pl.pallas_call(
        kernel,
        out_shape=(jax.ShapeDtypeStruct((Mp, N1), out1_dtype),
                   jax.ShapeDtypeStruct((Mp, N2), out2_dtype)),
        grid_spec=pltpu.PrefetchScalarGridSpec(
            num_scalar_prefetch=0,
            grid=(Mp // tm, K // tk),
            in_specs=[
                pl.BlockSpec((tm, tk), lambda i, k: (i, k)),
                pl.BlockSpec((tk, N1), lambda i, k: (k, 0)),
                pl.BlockSpec((2, N1), lambda i, k: (0, 0)),
                pl.BlockSpec((N1, N2), lambda i, k: (0, 0)),
                pl.BlockSpec((2, N2), lambda i, k: (0, 0)),
            ],
            out_specs=(pl.BlockSpec((tm, N1), lambda i, k: (i, 0)),
                       pl.BlockSpec((tm, N2), lambda i, k: (i, 0))),
            scratch_shapes=[pltpu.VMEM((tm, N1), jnp.float32)],
        ),
        compiler_params=pltpu.CompilerParams(
            dimension_semantics=("parallel", "arbitrary"),
            vmem_limit_bytes=_VMEM_LIMIT),
    )(x, w1, ss1, w2, ss2)
    if Mp != M:
        o1, o2 = o1[:M], o2[:M]
    return o1, o2


# ---------------------------------------------------------------------------
# Plain-JAX glue (runs fused under jit): im2col, conv wrappers, reorg, params
# ---------------------------------------------------------------------------
def _im2col(x_nhwc, ksize, stride, pad):
    B, H, W, C = x_nhwc.shape
    if pad:
        x_nhwc = jnp.pad(x_nhwc, ((0, 0), (pad, pad), (pad, pad), (0, 0)))
    Ho = (H + 2 * pad - ksize) // stride + 1
    Wo = (W + 2 * pad - ksize) // stride + 1
    cols = []
    for ki in range(ksize):
        for kj in range(ksize):
            cols.append(x_nhwc[:, ki:ki + stride * (Ho - 1) + 1:stride,
                               kj:kj + stride * (Wo - 1) + 1:stride, :])
    patches = jnp.concatenate(cols, axis=-1)        # channel index (ki*k + kj)*C + c
    return patches.reshape(B * Ho * Wo, ksize * ksize * C), (B, Ho, Wo)


def conv_bn_act(x_nhwc, w2d, ss, *, ksize, stride=1, apply_act=True,
                out_dtype=jnp.bfloat16):
    patches, (B, Ho, Wo) = _im2col(x_nhwc, ksize, stride, ksize // 2)
    out = matmul_bn_act(patches, w2d, ss, apply_act=apply_act, out_dtype=out_dtype)
    return out.reshape(B, Ho, Wo, -1)


def conv_bn_act_fused2(x_nhwc, p1, p2, *, ksize, stride=1, act1=True, act2=True,
                       out1_dtype=jnp.bfloat16, out2_dtype=jnp.bfloat16):
    """conv(ksize)+BN+act1 with a second 1x1 conv (+affine, act2) fused into the
    same kernel's epilogue. Returns both feature maps (NHWC, channel-padded)."""
    w1, ss1 = p1
    w2, ss2 = p2
    patches, (B, Ho, Wo) = _im2col(x_nhwc, ksize, stride, ksize // 2)
    o1, o2 = matmul_bn_act_fused2(patches, w1, ss1, w2, ss2, act1=act1, act2=act2,
                                  out1_dtype=out1_dtype, out2_dtype=out2_dtype)
    return o1.reshape(B, Ho, Wo, -1), o2.reshape(B, Ho, Wo, -1)


def reorg_nhwc(x, s=2):
    """NHWC equivalent of the reference PyTorch Reorg:
    out[b, hh, ww, (s1*s + s2)*C + c] = in_nchw[b, c, hh*s + s1, ww*s + s2],
    which is exactly what the reference view/transpose chain computes."""
    B, H, W, C = x.shape
    h, w = H // s, W // s
    y = x.reshape(B, h, s, w, s, C)
    y = jnp.transpose(y, (0, 1, 3, 2, 4, 5))        # (B, h, w, s1, s2, C)
    return y.reshape(B, h, w, s * s * C)


def _conv_w(key, kh, kw, cin, cout):
    fan_in = kh * kw * cin
    return jax.random.normal(key, (kh, kw, cin, cout), jnp.float32) / jnp.sqrt(fan_in)


def _bn_fold(key, c, eps=1e-5):
    k1, k2, k3, k4 = jax.random.split(key, 4)
    gamma = jax.random.uniform(k1, (c,), jnp.float32, 0.5, 1.5)
    beta = 0.1 * jax.random.normal(k2, (c,), jnp.float32)
    mean = 0.1 * jax.random.normal(k3, (c,), jnp.float32)
    var = jax.random.uniform(k4, (c,), jnp.float32, 0.5, 1.5)
    scale = gamma / jnp.sqrt(var + eps)
    shift = beta - mean * scale
    return scale, shift


def _pad_w(w_hwio, cin_p, cout_p):
    """Zero-pad Cin/Cout to lane-aligned sizes, flatten to (k*k*cin_p, cout_p), bf16."""
    kh, kw, cin, cout = w_hwio.shape
    wp = jnp.zeros((kh, kw, cin_p, cout_p), jnp.float32)
    wp = wp.at[:, :, :cin, :cout].set(w_hwio)
    return wp.reshape(kh * kw * cin_p, cout_p).astype(jnp.bfloat16)


def _pack_ss(scale, shift, cout_p):
    """Pack folded-BN scale/shift into one (2, cout_p) f32 slab (pad shift = 0 so
    padded output channels stay exactly zero)."""
    c = scale.shape[0]
    ss = jnp.zeros((2, cout_p), jnp.float32)
    return ss.at[0, :c].set(scale).at[1, :c].set(shift)


# ---------------------------------------------------------------------------
# YOLOv2 model (scaled-down channel counts for a small runnable example)
# ---------------------------------------------------------------------------
class YOLOv2Pallas:
    def __init__(self, key, c_in=4, c1=32, c2=64, route_c=16,
                 num_anchors=5, num_classes=3):
        # c1 stands in for 512 (darknet conv_block1 output), c2 for 1024,
        # route_c for 64. All parameters are padded/packed once, here.
        self.det_out = num_anchors * (5 + num_classes)
        cinp, c1p, c2p, rcp = (_rup(c, LANE) for c in (c_in, c1, c2, route_c))
        doutp = _rup(self.det_out, LANE)
        catp = c2p + 4 * rcp        # channel-padded concat(x2, reorg(route(x1)))
        self.cinp = cinp

        ks = jax.random.split(key, 16)
        p = {}
        # darknet stand-ins: conv3x3 stride-2 + BN + LeakyReLU
        p["db1"] = (_pad_w(_conv_w(ks[0], 3, 3, c_in, c1), cinp, c1p),
                    _pack_ss(*_bn_fold(ks[1], c1), c1p))
        p["db2"] = (_pad_w(_conv_w(ks[2], 3, 3, c1, c2), c1p, c2p),
                    _pack_ss(*_bn_fold(ks[3], c2), c2p))
        # self.conv_block : two (conv3x3 -> BN -> LeakyReLU)
        p["cb1"] = (_pad_w(_conv_w(ks[4], 3, 3, c2, c2), c2p, c2p),
                    _pack_ss(*_bn_fold(ks[5], c2), c2p))
        p["cb2"] = (_pad_w(_conv_w(ks[6], 3, 3, c2, c2), c2p, c2p),
                    _pack_ss(*_bn_fold(ks[7], c2), c2p))
        # self.route : conv1x1 -> BN -> LeakyReLU (fused into db1's kernel epilogue)
        p["route"] = (_pad_w(_conv_w(ks[8], 1, 1, c1, route_c), c1p, rcp),
                      _pack_ss(*_bn_fold(ks[9], route_c), rcp))
        # self.detection[0] : conv3x3 -> BN -> LeakyReLU. Embed the real Cin rows
        # into the channel-padded concat layout (padded channels are exactly zero,
        # their weight rows stay zero).
        cat_real = c2 + 4 * route_c
        w_real = _conv_w(ks[10], 3, 3, cat_real, c2)
        w_emb = jnp.zeros((3, 3, catp, c2p), jnp.float32)
        w_emb = w_emb.at[:, :, :c2, :c2].set(w_real[:, :, :c2, :])
        for q in range(4):
            w_emb = w_emb.at[:, :, c2p + q * rcp: c2p + q * rcp + route_c, :c2].set(
                w_real[:, :, c2 + q * route_c: c2 + (q + 1) * route_c, :])
        p["det1"] = (w_emb.reshape(9 * catp, c2p).astype(jnp.bfloat16),
                     _pack_ss(*_bn_fold(ks[11], c2), c2p))
        # self.detection[3] : conv1x1 + bias (no BN, no act) -> fused into det1 epilogue
        w2 = _conv_w(ks[12], 1, 1, c2, self.det_out)[0, 0]
        bias = 0.1 * jax.random.normal(ks[13], (self.det_out,), jnp.float32)
        w2p = jnp.zeros((c2p, doutp), jnp.float32).at[:c2, :self.det_out].set(w2)
        ss2 = jnp.zeros((2, doutp), jnp.float32).at[0, :].set(1.0)
        ss2 = ss2.at[1, :self.det_out].set(bias)
        p["det2"] = (w2p.astype(jnp.bfloat16), ss2)

        self.p = p
        self._fwd = jax.jit(self._forward_impl)

    def _forward_impl(self, p, x_nchw):
        # NCHW -> NHWC, bf16, channel-padded once (kept padded through the network)
        x = jnp.transpose(x_nchw, (0, 2, 3, 1)).astype(jnp.bfloat16)
        x = jnp.pad(x, ((0, 0), (0, 0), (0, 0), (0, self.cinp - x.shape[-1])))
        # darknet stand-in block 1, with the route 1x1 fused into the same kernel
        x1, r1 = conv_bn_act_fused2(x, p["db1"], p["route"], ksize=3, stride=2)
        # darknet stand-in block 2
        x2 = conv_bn_act(x1, *p["db2"], ksize=3, stride=2)
        # self.conv_block
        x2 = conv_bn_act(x2, *p["cb1"], ksize=3)
        x2 = conv_bn_act(x2, *p["cb2"], ksize=3)
        # Reorg(stride=2) on the (channel-padded) route output
        r1 = reorg_nhwc(r1, 2)
        # torch.cat((x2, x1), dim=1) -> channel concat in NHWC (padded layout)
        xc = jnp.concatenate([x2, r1], axis=-1)
        # self.detection : conv3x3+BN+LeakyReLU with the final 1x1(+bias) fused in
        _, out = conv_bn_act_fused2(xc, p["det1"], p["det2"], ksize=3,
                                    act2=False, out2_dtype=jnp.float32)
        # strip channel padding; output is already NHWC == x.permute(0, 2, 3, 1)
        return out[..., :self.det_out]

    def forward(self, x_nchw):
        return self._fwd(self.p, x_nchw)


if __name__ == "__main__":
    key = jax.random.PRNGKey(0)
    kparams, kx = jax.random.split(key)
    model = YOLOv2Pallas(kparams)
    x = jax.random.normal(kx, (2, 4, 16, 16), jnp.float32)   # NCHW input
    out = model.forward(x)
    out = jax.block_until_ready(out)
    assert out.shape == (2, 4, 4, model.det_out), out.shape
    assert jnp.all(jnp.isfinite(out))
    print("KERNEL_OK")
</pallas_src>

<mosaic_0001>
module attributes {stable_mosaic.version = 11 : i64} {
  func.func @_mm_bn_act_fused2_kernel(%arg0: i32, %arg1: i32, %arg2: memref<64x384xbf16, #tpu.memory_space<vmem>>, %arg3: memref<384x128xbf16, #tpu.memory_space<vmem>>, %arg4: memref<2x128xf32, #tpu.memory_space<vmem>>, %arg5: memref<128x128xbf16, #tpu.memory_space<vmem>>, %arg6: memref<2x128xf32, #tpu.memory_space<vmem>>, %arg7: memref<64x128xbf16, #tpu.memory_space<vmem>>, %arg8: memref<64x128xbf16, #tpu.memory_space<vmem>>, %arg9: memref<64x128xf32, #tpu.memory_space<vmem>>) attributes {dimension_semantics = [#tpu.dimension_semantics<parallel>, #tpu.dimension_semantics<arbitrary>], iteration_bounds = array<i64: 2, 3>, scalar_prefetch = 0 : i64, scratch_operands = 1 : i64, tpu.core_type = #tpu.core_type<tc>, window_params = [{transform_indices = @transform_0, window_bounds = array<i64: 64, 384>}, {transform_indices = @transform_1, window_bounds = array<i64: 384, 128>}, {pipeline_mode = #tpu.pipeline_mode<synchronous>, transform_indices = @transform_2, window_bounds = array<i64: 2, 128>}, {pipeline_mode = #tpu.pipeline_mode<synchronous>, transform_indices = @transform_3, window_bounds = array<i64: 128, 128>}, {pipeline_mode = #tpu.pipeline_mode<synchronous>, transform_indices = @transform_4, window_bounds = array<i64: 2, 128>}, {transform_indices = @transform_5, window_bounds = array<i64: 64, 128>}, {transform_indices = @transform_6, window_bounds = array<i64: 64, 128>}]} {
    %c0_i32 = arith.constant 0 : i32
    %0 = arith.cmpi eq, %arg1, %c0_i32 : i32
    %1 = arith.extui %0 : i1 to i32
    %c0_i32_0 = arith.constant 0 : i32
    %2 = arith.cmpi ne, %1, %c0_i32_0 : i32
    scf.if %2 {
      %cst_9 = arith.constant 0.000000e+00 : f32
      %12 = vector.broadcast %cst_9 : f32 to vector<64x128xf32>
      %c0_10 = arith.constant 0 : index
      %c0_11 = arith.constant 0 : index
      %13 = vector.load %arg9[%c0_10, %c0_11] : memref<64x128xf32, #tpu.memory_space<vmem>>, vector<64x128xf32>
      tpu.vector_store %arg9[%c0_10, %c0_11], %12 {strides = array<i32>} : memref<64x128xf32, #tpu.memory_space<vmem>>, vector<64x128xf32>,
    } else {
    }
    %c0 = arith.constant 0 : index
    %c0_1 = arith.constant 0 : index
    %3 = vector.load %arg9[%c0, %c0_1] : memref<64x128xf32, #tpu.memory_space<vmem>>, vector<64x128xf32>
    %c0_2 = arith.constant 0 : index
    %c0_3 = arith.constant 0 : index
    %4 = vector.load %arg2[%c0_2, %c0_3] : memref<64x384xbf16, #tpu.memory_space<vmem>>, vector<64x384xbf16>
    %c0_4 = arith.constant 0 : index
    %c0_5 = arith.constant 0 : index
    %5 = vector.load %arg3[%c0_4, %c0_5] : memref<384x128xbf16, #tpu.memory_space<vmem>>, vector<384x128xbf16>
    %cst = arith.constant dense<0.000000e+00> : vector<64x128xf32>
    %6 = tpu.matmul %4, %5, %cst {dimension_numbers = #tpu.dot_dimension_numbers<[1], [0], [0], [1], [0, 0, 1, 1], [], []>} : vector<64x384xbf16>, vector<384x128xbf16>, vector<64x128xf32> -> vector<64x128xf32>
    %7 = arith.addf %3, %6 : vector<64x128xf32>
    %c0_6 = arith.constant 0 : index
    %c0_7 = arith.constant 0 : index
    %8 = vector.load %arg9[%c0_6, %c0_7] : memref<64x128xf32, #tpu.memory_space<vmem>>, vector<64x128xf32>
    tpu.vector_store %arg9[%c0_6, %c0_7], %7 {strides = array<i32>} : memref<64x128xf32, #tpu.memory_space<vmem>>, vector<64x128xf32>,
    %c2_i32 = arith.constant 2 : i32
    %9 = arith.cmpi eq, %arg1, %c2_i32 : i32
    %10 = arith.extui %9 : i1 to i32
    %c0_i32_8 = arith.constant 0 : i32
    %11 = arith.cmpi ne, %10, %c0_i32_8 : i32
    scf.if %11 {
      %c0_9 = arith.constant 0 : index
      %c0_10 = arith.constant 0 : index
      %12 = vector.load %arg9[%c0_9, %c0_10] : memref<64x128xf32, #tpu.memory_space<vmem>>, vector<64x128xf32>
      %c0_11 = arith.constant 0 : index
      %c0_12 = arith.constant 0 : index
      %13 = vector.load %arg4[%c0_11, %c0_12] : memref<2x128xf32, #tpu.memory_space<vmem>>, vector<1x128xf32>
      %14 = vector.broadcast %13 : vector<1x128xf32> to vector<64x128xf32>
      %15 = arith.mulf %12, %14 : vector<64x128xf32>
      %c1 = arith.constant 1 : index
      %c0_13 = arith.constant 0 : index
      %16 = vector.load %arg4[%c1, %c0_13] : memref<2x128xf32, #tpu.memory_space<vmem>>, vector<1x128xf32>
      %17 = vector.broadcast %16 : vector<1x128xf32> to vector<64x128xf32>
      %18 = arith.addf %15, %17 : vector<64x128xf32>
      %cst_14 = arith.constant 0.000000e+00 : f32
      %19 = vector.broadcast %cst_14 : f32 to vector<64x128xf32>
      %20 = arith.cmpf ogt, %18, %19 : vector<64x128xf32>
      %cst_15 = arith.constant 1.000000e-01 : f32
      %21 = vector.broadcast %cst_15 : f32 to vector<64x128xf32>
      %22 = arith.mulf %21, %18 : vector<64x128xf32>
      %23 = arith.select %20, %18, %22 : vector<64x128xi1>, vector<64x128xf32>
      %24 = arith.truncf %23 : vector<64x128xf32> to vector<64x128xbf16>
      %c0_16 = arith.constant 0 : index
      %c0_17 = arith.constant 0 : index
      %25 = vector.load %arg7[%c0_16, %c0_17] : memref<64x128xbf16, #tpu.memory_space<vmem>>, vector<64x128xbf16>
      tpu.vector_store %arg7[%c0_16, %c0_17], %24 {strides = array<i32>} : memref<64x128xbf16, #tpu.memory_space<vmem>>, vector<64x128xbf16>,
      %26 = arith.truncf %23 : vector<64x128xf32> to vector<64x128xbf16>
      %c0_18 = arith.constant 0 : index
      %c0_19 = arith.constant 0 : index
      %27 = vector.load %arg5[%c0_18, %c0_19] : memref<128x128xbf16, #tpu.memory_space<vmem>>, vector<128x128xbf16>
      %cst_20 = arith.constant dense<0.000000e+00> : vector<64x128xf32>
      %28 = tpu.matmul %26, %27, %cst_20 {dimension_numbers = #tpu.dot_dimension_numbers<[1], [0], [0], [1], [0, 0, 1, 1], [], []>} : vector<64x128xbf16>, vector<128x128xbf16>, vector<64x128xf32> -> vector<64x128xf32>
      %c0_21 = arith.constant 0 : index
      %c0_22 = arith.constant 0 : index
      %29 = vector.load %arg6[%c0_21, %c0_22] : memref<2x128xf32, #tpu.memory_space<vmem>>, vector<1x128xf32>
      %30 = vector.broadcast %29 : vector<1x128xf32> to vector<64x128xf32>
      %31 = arith.mulf %28, %30 : vector<64x128xf32>
      %c1_23 = arith.constant 1 : index
      %c0_24 = arith.constant 0 : index
      %32 = vector.load %arg6[%c1_23, %c0_24] : memref<2x128xf32, #tpu.memory_space<vmem>>, vector<1x128xf32>
      %33 = vector.broadcast %32 : vector<1x128xf32> to vector<64x128xf32>
      %34 = arith.addf %31, %33 : vector<64x128xf32>
      %cst_25 = arith.constant 0.000000e+00 : f32
      %35 = vector.broadcast %cst_25 : f32 to vector<64x128xf32>
      %36 = arith.cmpf ogt, %34, %35 : vector<64x128xf32>
      %cst_26 = arith.constant 1.000000e-01 : f32
      %37 = vector.broadcast %cst_26 : f32 to vector<64x128xf32>
      %38 = arith.mulf %37, %34 : vector<64x128xf32>
      %39 = arith.select %36, %34, %38 : vector<64x128xi1>, vector<64x128xf32>
      %40 = arith.truncf %39 : vector<64x128xf32> to vector<64x128xbf16>
      %c0_27 = arith.constant 0 : index
      %c0_28 = arith.constant 0 : index
      %41 = vector.load %arg8[%c0_27, %c0_28] : memref<64x128xbf16, #tpu.memory_space<vmem>>, vector<64x128xbf16>
      tpu.vector_store %arg8[%c0_27, %c0_28], %40 {strides = array<i32>} : memref<64x128xbf16, #tpu.memory_space<vmem>>, vector<64x128xbf16>,
    } else {
    }
    return
  }
  func.func @transform_0(%arg0: i32, %arg1: i32) -> (i32, i32) {
    %c0_i32 = arith.constant 0 : i32
    return %arg0, %arg1 : i32, i32
  }
  func.func @transform_1(%arg0: i32, %arg1: i32) -> (i32, i32) {
    %c0_i32 = arith.constant 0 : i32
    %c0_i32_0 = arith.constant 0 : i32
    return %arg1, %c0_i32 : i32, i32
  }
  func.func @transform_2(%arg0: i32, %arg1: i32) -> (i32, i32) {
    %c0_i32 = arith.constant 0 : i32
    %c0_i32_0 = arith.constant 0 : i32
    %c0_i32_1 = arith.constant 0 : i32
    return %c0_i32, %c0_i32_0 : i32, i32
  }
  func.func @transform_3(%arg0: i32, %arg1: i32) -> (i32, i32) {
    %c0_i32 = arith.constant 0 : i32
    %c0_i32_0 = arith.constant 0 : i32
    %c0_i32_1 = arith.constant 0 : i32
    return %c0_i32, %c0_i32_0 : i32, i32
  }
  func.func @transform_4(%arg0: i32, %arg1: i32) -> (i32, i32) {
    %c0_i32 = arith.constant 0 : i32
    %c0_i32_0 = arith.constant 0 : i32
    %c0_i32_1 = arith.constant 0 : i32
    return %c0_i32, %c0_i32_0 : i32, i32
  }
  func.func @transform_5(%arg0: i32, %arg1: i32) -> (i32, i32) {
    %c0_i32 = arith.constant 0 : i32
    %c0_i32_0 = arith.constant 0 : i32
    return %arg0, %c0_i32 : i32, i32
  }
  func.func @transform_6(%arg0: i32, %arg1: i32) -> (i32, i32) {
    %c0_i32 = arith.constant 0 : i32
    %c0_i32_0 = arith.constant 0 : i32
    return %arg0, %c0_i32 : i32, i32
  }
}

module attributes {stable_mosaic.version = 11 : i64} {
  func.func @_mm_bn_act_kernel(%arg0: i32, %arg1: i32, %arg2: i32, %arg3: memref<16x384xbf16, #tpu.memory_space<vmem>>, %arg4: memref<384x128xbf16, #tpu.memory_space<vmem>>, %arg5: memref<2x128xf32, #tpu.memory_space<vmem>>, %arg6: memref<16x128xbf16, #tpu.memory_space<vmem>>, %arg7: memref<16x128xf32, #tpu.memory_space<vmem>>) attributes {dimension_semantics = [#tpu.dimension_semantics<parallel>, #tpu.dimension_semantics<parallel>, #tpu.dimension_semantics<arbitrary>], iteration_bounds = array<i64: 2, 1, 3>, scalar_prefetch = 0 : i64, scratch_operands = 1 : i64, tpu.core_type = #tpu.core_type<tc>, window_params = [{transform_indices = @transform_0, window_bounds = array<i64: 16, 384>}, {transform_indices = @transform_1, window_bounds = array<i64: 384, 128>}, {transform_indices = @transform_2, window_bounds = array<i64: 2, 128>}, {transform_indices = @transform_3, window_bounds = array<i64: 16, 128>}]} {
    %c0_i32 = arith.constant 0 : i32
    %0 = arith.cmpi eq, %arg2, %c0_i32 : i32
    %1 = arith.extui %0 : i1 to i32
    %c0_i32_0 = arith.constant 0 : i32
    %2 = arith.cmpi ne, %1, %c0_i32_0 : i32
    scf.if %2 {
      %cst_9 = arith.constant 0.000000e+00 : f32
      %12 = vector.broadcast %cst_9 : f32 to vector<16x128xf32>
      %c0_10 = arith.constant 0 : index
      %c0_11 = arith.constant 0 : index
      %13 = vector.load %arg7[%c0_10, %c0_11] : memref<16x128xf32, #tpu.memory_space<vmem>>, vector<16x128xf32>
      tpu.vector_store %arg7[%c0_10, %c0_11], %12 {strides = array<i32>} : memref<16x128xf32, #tpu.memory_space<vmem>>, vector<16x128xf32>,
    } else {
    }
    %c0 = arith.constant 0 : index
    %c0_1 = arith.constant 0 : index
    %3 = vector.load %arg7[%c0, %c0_1] : memref<16x128xf32, #tpu.memory_space<vmem>>, vector<16x128xf32>
    %c0_2 = arith.constant 0 : index
    %c0_3 = arith.constant 0 : index
    %4 = vector.load %arg3[%c0_2, %c0_3] : memref<16x384xbf16, #tpu.memory_space<vmem>>, vector<16x384xbf16>
    %c0_4 = arith.constant 0 : index
    %c0_5 = arith.constant 0 : index
    %5 = vector.load %arg4[%c0_4, %c0_5] : memref<384x128xbf16, #tpu.memory_space<vmem>>, vector<384x128xbf16>
    %cst = arith.constant dense<0.000000e+00> : vector<16x128xf32>
    %6 = tpu.matmul %4, %5, %cst {dimension_numbers = #tpu.dot_dimension_numbers<[1], [0], [0], [1], [0, 0, 1, 1], [], []>} : vector<16x384xbf16>, vector<384x128xbf16>, vector<16x128xf32> -> vector<16x128xf32>
    %7 = arith.addf %3, %6 : vector<16x128xf32>
    %c0_6 = arith.constant 0 : index
    %c0_7 = arith.constant 0 : index
    %8 = vector.load %arg7[%c0_6, %c0_7] : memref<16x128xf32, #tpu.memory_space<vmem>>, vector<16x128xf32>
    tpu.vector_store %arg7[%c0_6, %c0_7], %7 {strides = array<i32>} : memref<16x128xf32, #tpu.memory_space<vmem>>, vector<16x128xf32>,
    %c2_i32 = arith.constant 2 : i32
    %9 = arith.cmpi eq, %arg2, %c2_i32 : i32
    %10 = arith.extui %9 : i1 to i32
    %c0_i32_8 = arith.constant 0 : i32
    %11 = arith.cmpi ne, %10, %c0_i32_8 : i32
    scf.if %11 {
      %c0_9 = arith.constant 0 : index
      %c0_10 = arith.constant 0 : index
      %12 = vector.load %arg7[%c0_9, %c0_10] : memref<16x128xf32, #tpu.memory_space<vmem>>, vector<16x128xf32>
      %c0_11 = arith.constant 0 : index
      %c0_12 = arith.constant 0 : index
      %13 = vector.load %arg5[%c0_11, %c0_12] : memref<2x128xf32, #tpu.memory_space<vmem>>, vector<1x128xf32>
      %14 = vector.broadcast %13 : vector<1x128xf32> to vector<16x128xf32>
      %15 = arith.mulf %12, %14 : vector<16x128xf32>
      %c1 = arith.constant 1 : index
      %c0_13 = arith.constant 0 : index
      %16 = vector.load %arg5[%c1, %c0_13] : memref<2x128xf32, #tpu.memory_space<vmem>>, vector<1x128xf32>
      %17 = vector.broadcast %16 : vector<1x128xf32> to vector<16x128xf32>
      %18 = arith.addf %15, %17 : vector<16x128xf32>
      %cst_14 = arith.constant 0.000000e+00 : f32
      %19 = vector.broadcast %cst_14 : f32 to vector<16x128xf32>
      %20 = arith.cmpf ogt, %18, %19 : vector<16x128xf32>
      %cst_15 = arith.constant 1.000000e-01 : f32
      %21 = vector.broadcast %cst_15 : f32 to vector<16x128xf32>
      %22 = arith.mulf %21, %18 : vector<16x128xf32>
      %23 = arith.select %20, %18, %22 : vector<16x128xi1>, vector<16x128xf32>
      %24 = arith.truncf %23 : vector<16x128xf32> to vector<16x128xbf16>
      %c0_16 = arith.constant 0 : index
      %c0_17 = arith.constant 0 : index
      %25 = vector.load %arg6[%c0_16, %c0_17] : memref<16x128xbf16, #tpu.memory_space<vmem>>, vector<16x128xbf16>
      tpu.vector_store %arg6[%c0_16, %c0_17], %24 {strides = array<i32>} : memref<16x128xbf16, #tpu.memory_space<vmem>>, vector<16x128xbf16>,
    } else {
    }
    return
  }
  func.func @transform_0(%arg0: i32, %arg1: i32, %arg2: i32) -> (i32, i32) {
    %c0_i32 = arith.constant 0 : i32
    return %arg0, %arg2 : i32, i32
  }
  func.func @transform_1(%arg0: i32, %arg1: i32, %arg2: i32) -> (i32, i32) {
    %c0_i32 = arith.constant 0 : i32
    return %arg2, %arg1 : i32, i32
  }
  func.func @transform_2(%arg0: i32, %arg1: i32, %arg2: i32) -> (i32, i32) {
    %c0_i32 = arith.constant 0 : i32
    %c0_i32_0 = arith.constant 0 : i32
    return %c0_i32, %arg1 : i32, i32
  }
  func.func @transform_3(%arg0: i32, %arg1: i32, %arg2: i32) -> (i32, i32) {
    %c0_i32 = arith.constant 0 : i32
    return %arg0, %arg1 : i32, i32
  }
}

module attributes {stable_mosaic.version = 11 : i64} {
  func.func @_mm_bn_act_fused2_kernel(%arg0: i32, %arg1: i32, %arg2: memref<16x384xbf16, #tpu.memory_space<vmem>>, %arg3: memref<384x128xbf16, #tpu.memory_space<vmem>>, %arg4: memref<2x128xf32, #tpu.memory_space<vmem>>, %arg5: memref<128x128xbf16, #tpu.memory_space<vmem>>, %arg6: memref<2x128xf32, #tpu.memory_space<vmem>>, %arg7: memref<16x128xbf16, #tpu.memory_space<vmem>>, %arg8: memref<16x128xf32, #tpu.memory_space<vmem>>, %arg9: memref<16x128xf32, #tpu.memory_space<vmem>>) attributes {dimension_semantics = [#tpu.dimension_semantics<parallel>, #tpu.dimension_semantics<arbitrary>], iteration_bounds = array<i64: 2, 15>, scalar_prefetch = 0 : i64, scratch_operands = 1 : i64, tpu.core_type = #tpu.core_type<tc>, window_params = [{transform_indices = @transform_0, window_bounds = array<i64: 16, 384>}, {transform_indices = @transform_1, window_bounds = array<i64: 384, 128>}, {pipeline_mode = #tpu.pipeline_mode<synchronous>, transform_indices = @transform_2, window_bounds = array<i64: 2, 128>}, {pipeline_mode = #tpu.pipeline_mode<synchronous>, transform_indices = @transform_3, window_bounds = array<i64: 128, 128>}, {pipeline_mode = #tpu.pipeline_mode<synchronous>, transform_indices = @transform_4, window_bounds = array<i64: 2, 128>}, {transform_indices = @transform_5, window_bounds = array<i64: 16, 128>}, {transform_indices = @transform_6, window_bounds = array<i64: 16, 128>}]} {
    %c0_i32 = arith.constant 0 : i32
    %0 = arith.cmpi eq, %arg1, %c0_i32 : i32
    %1 = arith.extui %0 : i1 to i32
    %c0_i32_0 = arith.constant 0 : i32
    %2 = arith.cmpi ne, %1, %c0_i32_0 : i32
    scf.if %2 {
      %cst_9 = arith.constant 0.000000e+00 : f32
      %12 = vector.broadcast %cst_9 : f32 to vector<16x128xf32>
      %c0_10 = arith.constant 0 : index
      %c0_11 = arith.constant 0 : index
      %13 = vector.load %arg9[%c0_10, %c0_11] : memref<16x128xf32, #tpu.memory_space<vmem>>, vector<16x128xf32>
      tpu.vector_store %arg9[%c0_10, %c0_11], %12 {strides = array<i32>} : memref<16x128xf32, #tpu.memory_space<vmem>>, vector<16x128xf32>,
    } else {
    }
    %c0 = arith.constant 0 : index
    %c0_1 = arith.constant 0 : index
    %3 = vector.load %arg9[%c0, %c0_1] : memref<16x128xf32, #tpu.memory_space<vmem>>, vector<16x128xf32>
    %c0_2 = arith.constant 0 : index
    %c0_3 = arith.constant 0 : index
    %4 = vector.load %arg2[%c0_2, %c0_3] : memref<16x384xbf16, #tpu.memory_space<vmem>>, vector<16x384xbf16>
    %c0_4 = arith.constant 0 : index
    %c0_5 = arith.constant 0 : index
    %5 = vector.load %arg3[%c0_4, %c0_5] : memref<384x128xbf16, #tpu.memory_space<vmem>>, vector<384x128xbf16>
    %cst = arith.constant dense<0.000000e+00> : vector<16x128xf32>
    %6 = tpu.matmul %4, %5, %cst {dimension_numbers = #tpu.dot_dimension_numbers<[1], [0], [0], [1], [0, 0, 1, 1], [], []>} : vector<16x384xbf16>, vector<384x128xbf16>, vector<16x128xf32> -> vector<16x128xf32>
    %7 = arith.addf %3, %6 : vector<16x128xf32>
    %c0_6 = arith.constant 0 : index
    %c0_7 = arith.constant 0 : index
    %8 = vector.load %arg9[%c0_6, %c0_7] : memref<16x128xf32, #tpu.memory_space<vmem>>, vector<16x128xf32>
    tpu.vector_store %arg9[%c0_6, %c0_7], %7 {strides = array<i32>} : memref<16x128xf32, #tpu.memory_space<vmem>>, vector<16x128xf32>,
    %c14_i32 = arith.constant 14 : i32
    %9 = arith.cmpi eq, %arg1, %c14_i32 : i32
    %10 = arith.extui %9 : i1 to i32
    %c0_i32_8 = arith.constant 0 : i32
    %11 = arith.cmpi ne, %10, %c0_i32_8 : i32
    scf.if %11 {
      %c0_9 = arith.constant 0 : index
      %c0_10 = arith.constant 0 : index
      %12 = vector.load %arg9[%c0_9, %c0_10] : memref<16x128xf32, #tpu.memory_space<vmem>>, vector<16x128xf32>
      %c0_11 = arith.constant 0 : index
      %c0_12 = arith.constant 0 : index
      %13 = vector.load %arg4[%c0_11, %c0_12] : memref<2x128xf32, #tpu.memory_space<vmem>>, vector<1x128xf32>
      %14 = vector.broadcast %13 : vector<1x128xf32> to vector<16x128xf32>
      %15 = arith.mulf %12, %14 : vector<16x128xf32>
      %c1 = arith.constant 1 : index
      %c0_13 = arith.constant 0 : index
      %16 = vector.load %arg4[%c1, %c0_13] : memref<2x128xf32, #tpu.memory_space<vmem>>, vector<1x128xf32>
      %17 = vector.broadcast %16 : vector<1x128xf32> to vector<16x128xf32>
      %18 = arith.addf %15, %17 : vector<16x128xf32>
      %cst_14 = arith.constant 0.000000e+00 : f32
      %19 = vector.broadcast %cst_14 : f32 to vector<16x128xf32>
      %20 = arith.cmpf ogt, %18, %19 : vector<16x128xf32>
      %cst_15 = arith.constant 1.000000e-01 : f32
      %21 = vector.broadcast %cst_15 : f32 to vector<16x128xf32>
      %22 = arith.mulf %21, %18 : vector<16x128xf32>
      %23 = arith.select %20, %18, %22 : vector<16x128xi1>, vector<16x128xf32>
      %24 = arith.truncf %23 : vector<16x128xf32> to vector<16x128xbf16>
      %c0_16 = arith.constant 0 : index
      %c0_17 = arith.constant 0 : index
      %25 = vector.load %arg7[%c0_16, %c0_17] : memref<16x128xbf16, #tpu.memory_space<vmem>>, vector<16x128xbf16>
      tpu.vector_store %arg7[%c0_16, %c0_17], %24 {strides = array<i32>} : memref<16x128xbf16, #tpu.memory_space<vmem>>, vector<16x128xbf16>,
      %26 = arith.truncf %23 : vector<16x128xf32> to vector<16x128xbf16>
      %c0_18 = arith.constant 0 : index
      %c0_19 = arith.constant 0 : index
      %27 = vector.load %arg5[%c0_18, %c0_19] : memref<128x128xbf16, #tpu.memory_space<vmem>>, vector<128x128xbf16>
      %cst_20 = arith.constant dense<0.000000e+00> : vector<16x128xf32>
      %28 = tpu.matmul %26, %27, %cst_20 {dimension_numbers = #tpu.dot_dimension_numbers<[1], [0], [0], [1], [0, 0, 1, 1], [], []>} : vector<16x128xbf16>, vector<128x128xbf16>, vector<16x128xf32> -> vector<16x128xf32>
      %c0_21 = arith.constant 0 : index
      %c0_22 = arith.constant 0 : index
      %29 = vector.load %arg6[%c0_21, %c0_22] : memref<2x128xf32, #tpu.memory_space<vmem>>, vector<1x128xf32>
      %30 = vector.broadcast %29 : vector<1x128xf32> to vector<16x128xf32>
      %31 = arith.mulf %28, %30 : vector<16x128xf32>
      %c1_23 = arith.constant 1 : index
      %c0_24 = arith.constant 0 : index
      %32 = vector.load %arg6[%c1_23, %c0_24] : memref<2x128xf32, #tpu.memory_space<vmem>>, vector<1x128xf32>
      %33 = vector.broadcast %32 : vector<1x128xf32> to vector<16x128xf32>
      %34 = arith.addf %31, %33 : vector<16x128xf32>
      %c0_25 = arith.constant 0 : index
      %c0_26 = arith.constant 0 : index
      %35 = vector.load %arg8[%c0_25, %c0_26] : memref<16x128xf32, #tpu.memory_space<vmem>>, vector<16x128xf32>
      tpu.vector_store %arg8[%c0_25, %c0_26], %34 {strides = array<i32>} : memref<16x128xf32, #tpu.memory_space<vmem>>, vector<16x128xf32>,
    } else {
    }
    return
  }
  func.func @transform_0(%arg0: i32, %arg1: i32) -> (i32, i32) {
    %c0_i32 = arith.constant 0 : i32
    return %arg0, %arg1 : i32, i32
  }
  func.func @transform_1(%arg0: i32, %arg1: i32) -> (i32, i32) {
    %c0_i32 = arith.constant 0 : i32
    %c0_i32_0 = arith.constant 0 : i32
    return %arg1, %c0_i32 : i32, i32
  }
  func.func @transform_2(%arg0: i32, %arg1: i32) -> (i32, i32) {
    %c0_i32 = arith.constant 0 : i32
    %c0_i32_0 = arith.constant 0 : i32
    %c0_i32_1 = arith.constant 0 : i32
    return %c0_i32, %c0_i32_0 : i32, i32
  }
  func.func @transform_3(%arg0: i32, %arg1: i32) -> (i32, i32) {
    %c0_i32 = arith.constant 0 : i32
    %c0_i32_0 = arith.constant 0 : i32
    %c0_i32_1 = arith.constant 0 : i32
    return %c0_i32, %c0_i32_0 : i32, i32
  }
  func.func @transform_4(%arg0: i32, %arg1: i32) -> (i32, i32) {
    %c0_i32 = arith.constant 0 : i32
    %c0_i32_0 = arith.constant 0 : i32
    %c0_i32_1 = arith.constant 0 : i32
    return %c0_i32, %c0_i32_0 : i32, i32
  }
  func.func @transform_5(%arg0: i32, %arg1: i32) -> (i32, i32) {
    %c0_i32 = arith.constant 0 : i32
    %c0_i32_0 = arith.constant 0 : i32
    return %arg0, %c0_i32 : i32, i32
  }
  func.func @transform_6(%arg0: i32, %arg1: i32) -> (i32, i32) {
    %c0_i32 = arith.constant 0 : i32
    %c0_i32_0 = arith.constant 0 : i32
    return %arg0, %c0_i32 : i32, i32
  }
}

</mosaic_0001>

<bundles_post_ra>
// kernel: _forward_impl.5
= control target key start
LH: loop header
LB: loop body
LE: loop exit
PB: predicated region body
PF: predicated region fallthrough
CT: control target
= control target key end

     0   :  { %s1741_s21 = smov 0   ;;  %s1743_s22 = smov 0   ;;  %s1946_s0 = inlined_call_operand.vmem [shape: bf16[128,1152], index: 0, kind: input, shape index: {}]   ;;  %s1947_s1 = inlined_call_operand.vmem [shape: bf16[1152,128], index: 1, kind: input, shape index: {}]   ;;  %s1948_s2 = inlined_call_operand.vmem [shape: f32[2,128], index: 2, kind: input, shape index: {}]   ;;  %s1949_s3 = inlined_call_operand.vmem [shape: bf16[128,128], index: 3, kind: input, shape index: {}]   ;;  %s1950_s4 = inlined_call_operand.vmem [shape: f32[2,128], index: 4, kind: input, shape index: {}]   ;;  %s1951_s5 = inlined_call_operand.vmem [shape: bf16[128,128], index: 5, kind: output, shape index: {0}]   ;;  %s1952_s6 = inlined_call_operand.vmem [shape: bf16[128,128], index: 6, kind: output, shape index: {1}]  }
   0x1   :  { %s1745_s23 = smov 0   ;;  %s1747_s24 = smov 0  }
   0x2   :  { %s1749_s25 = smov 0   ;;  %s1751_s26 = smov 0  }
   0x3   :  { %s1753_s27 = smov 0  }
   0x4 LB: > { %s26_s28 = sadd.s32 1, %s1695_s25  ;;  %s29_s29 = sadd.s32 1, %s1699_s26  ;;  %s1703_s27 = sphi %s1753_s27, %s17_s27   ;;  %s1699_s26 = sphi %s1751_s26, %s1958_s26   ;;  %s1695_s25 = sphi %s1749_s25, %s1957_s25   ;;  %s1691_s24 = sphi %s1747_s24, %s1956_s24   ;;  %s1687_s23 = sphi %s1745_s23, %s1955_s23   ;;  %s1683_s22 = sphi %s1743_s22, %s1954_s22   ;;  %s1679_s21 = sphi %s1741_s21, %s1953_s21  }
   0x5   : > { %p27_p0 = scmp.ge.s32.totalorder %s26_s28, 3  ;;  %p45_p1 = scmp.ne.s32.totalorder %s1683_s22, %s1679_s21 }
   0x6   : > { %p46_p2 = scmp.eq.s32.totalorder %s1703_s27, 0  ;;  %s38_s9 = sadd.s32 1, %s1683_s22 }
   0x7   : > { %s1960_s28 = smov (%p27_p0, %s26_s28), 0  ;;  %s1962_s29 = smov (!%p27_p0, %s29_s29), %s1699_s26 }
   0x8   : > { %p47_p3 = por %p46_p2, %p45_p1  ;;  %p31_p4 = scmp.ge.s32.totalorder %s1962_s29, 2 }
   0x9   : > { %s34_s30 = ssub.s32 %s1695_s25, %s1960_s28  ;;  %p1257_p6 = scmp.ge.s32.totalorder %s1703_s27, 6 }
   0xa   : > { %s1964_s29 = smov (%p31_p4, %s1962_s29), 0 }
   0xb   : > { %s33_s7 = ssub.s32 %s1699_s26, %s1964_s29  ;;  %221 = sbr.rel (%p1257_p6) target bundleno = 36 (0x24), region = 28 }
   0xc   : > { %s35_s8 = sor.u32 %s34_s30, %s33_s7 }
   0xd   : > { %p36_p5 = scmp.eq.s32.totalorder %s35_s8, 0 }
   0xf   : > { %s1792_s10 = scalar_select %p36_p5, %s1683_s22, %s38_s9  }
  0x12   : > { %224 = sbr.rel (!%p47_p3) target bundleno = 36 (0x24), region = 32  ;;  %s226_s11 = sand.u32 (%p47_p3), 1, %s1683_s22  }
  0x13   : > { %s230_s12 = smul.u32 (%p47_p3), 3, %s1695_s25 }
  0x14   : > { %s1541_s13 = smul.u32 (%p47_p3), 96, %s226_s11 }
  0x15   : > { %s1542_s14 = smul.u32 (%p47_p3), 72, %s1699_s26 }
  0x16   : > { %s228_s20 = scalar_lea.vmem (%p47_p3), [#allocation3], %s1541_s13 }
  0x17   : > { %s232_s15 = sadd.s32 (%p47_p3), %s1542_s14, %s230_s12 }
  0x18   : > { %s1260_s16 = sshll.u32 (%p47_p3), %s232_s15, 2 }
  0x19   : > { %s1801_s19 = scalar_lea.vmem %s1946_s0, %s1260_s16 }
  0x1a   : > { %v249_v0 = vld [vmem:[%s1801_s19] sm:$0xff]  ;;  %v253_v2 = vld [vmem:[%s1801_s19 + $0x48] sm:$0xff]  ;;  %v257_v4 = vld [vmem:[%s1801_s19 + $0x90] sm:$0xff] }
  0x1b   : > { %v251_v1 = vld [vmem:[%s1801_s19 + $0x24] sm:$0xff]  ;;  %250 = vst [vmem:[%s228_s20] sm:$0xff] %v249_v0  ;;  %254 = vst [vmem:[%s228_s20 + $0x18] sm:$0xff] %v253_v2  ;;  %v255_v3 = vld [vmem:[%s1801_s19 + $0x6c] sm:$0xff] }
  0x1c   : > { %252 = vst [vmem:[%s228_s20 + $0xc] sm:$0xff] %v251_v1  ;;  %v259_v5 = vld [vmem:[%s1801_s19 + $0xb4] sm:$0xff]  ;;  %256 = vst [vmem:[%s228_s20 + $0x24] sm:$0xff] %v255_v3  ;;  %v263_v7 = vld [vmem:[%s1801_s19 + $0xfc] sm:$0xff] }
  0x1d   : > { %258 = vst [vmem:[%s228_s20 + $0x30] sm:$0xff] %v257_v4  ;;  %260 = vst [vmem:[%s228_s20 + $0x3c] sm:$0xff] %v259_v5  ;;  %v261_v6 = vld [vmem:[%s1801_s19 + $0xd8] sm:$0xff]  ;;  %v1261_v8 = vld [vmem:[%s1801_s19 + $0x8] sm:$0xf] }
  0x1e   : > { %262 = vst [vmem:[%s228_s20 + $0x48] sm:$0xff] %v261_v6  ;;  %264 = vst [vmem:[%s228_s20 + $0x54] sm:$0xff] %v263_v7  ;;  %v1263_v9 = vld [vmem:[%s1801_s19 + $0x2c] sm:$0xf]  ;;  %v1265_v10 = vld [vmem:[%s1801_s19 + $0x50] sm:$0xf] }
  0x1f   : > { %1262 = vst [vmem:[%s228_s20 + $0x8] sm:$0xf] %v1261_v8  ;;  %v1267_v11 = vld [vmem:[%s1801_s19 + $0x74] sm:$0xf]  ;;  %1264 = vst [vmem:[%s228_s20 + $0x14] sm:$0xf] %v1263_v9 }
  0x20   : > { %1266 = vst [vmem:[%s228_s20 + $0x20] sm:$0xf] %v1265_v10  ;;  %1268 = vst [vmem:[%s228_s20 + $0x2c] sm:$0xf] %v1267_v11  ;;  %v1269_v12 = vld [vmem:[%s1801_s19 + $0x98] sm:$0xf] }
  0x21   : > { %v1271_v13 = vld [vmem:[%s1801_s19 + $0xbc] sm:$0xf]  ;;  %v1273_v14 = vld [vmem:[%s1801_s19 + $0xe0] sm:$0xf]  ;;  %1270 = vst [vmem:[%s228_s20 + $0x38] sm:$0xf] %v1269_v12 }
  0x22   : > { %1272 = vst [vmem:[%s228_s20 + $0x44] sm:$0xf] %v1271_v13  ;;  %1274 = vst [vmem:[%s228_s20 + $0x50] sm:$0xf] %v1273_v14  ;;  %v1275_v15 = vld [vmem:[%s1801_s19 + $0x104] sm:$0xf] }
  0x23   : > { %1276 = vst [vmem:[%s228_s20 + $0x5c] sm:$0xf] %v1275_v15 }
  0x24 PF: > { %p1277_p7 = scmp.ge.s32.totalorder %s1703_s27, 1  ;;  %p301_p8 = scmp.lt.s32.totalorder %s1703_s27, 7 }
  0x26   : > { %p302_p9 = pnand %p1277_p7, %p301_p8 }
  0x27   : > { %s308_s30 = sand.u32 (!%p302_p9), 1, %s1679_s21   ;;  %s349_s7 = smul.u32 (!%p302_p9), 48, %s1687_s23 }
  0x28   : > { %305 = sbr.rel (%p302_p9) target bundleno = 577 (0x241), region = 62  ;;  %s1279_s9 = sshll.u32 (!%p302_p9), %s1691_s24, 3 }
  0x29   : > { %s1543_s8 = smul.u32 (!%p302_p9), 96, %s308_s30  ;;  %p350_p10 = scmp.lt.s32.totalorder (!%p302_p9), %s349_s7, 143 }
  0x2a   : > { %p356_p11 = scmp.lt.s32.totalorder (!%p302_p9), %s1279_s9, 15  ;;  %p1283_p12 = scmp.ne.s32.totalorder (!%p302_p9), %s1687_s23, 0 }
  0x2b   : > { %s1839_s20 = scalar_lea.vmem (!%p302_p9), [#allocation3], %s1543_s8 }
  0x2f   : > { %s1966_s7 = smov (!%p350_p10, %s349_s7), 143  ;;  %s1968_s9 = smov (!%p356_p11, %s1279_s9), 15 }
  0x30   : > { %s1278_s11 = sshll.u32 %s1966_s7, 2  ;;  %s1280_s15 = sshll.u32 %s1968_s9, 2  ;;  %v1705_v16 = vmov (!%p1283_p12), 0.0  }
  0x31   : > { %s1827_s14 = scalar_lea.vmem %s1947_s1, %s1278_s11  ;;  %s1832_s18 = scalar_lea.vmem %s1951_s5, %s1280_s15  ;;  %372 = vst [vmem:[#allocation2] sm:$0xff] (!%p1283_p12), %v1705_v16  ;;  %373 = vst [vmem:[#allocation2 + $0x8] sm:$0xff] (!%p1283_p12), %v1705_v16 }
  0x32   : > { %s1837_s24 = scalar_lea.vmem %s1952_s6, %s1280_s15  ;;  %371 = sbr.rel (%p1283_p12) target bundleno = 57 (0x39), region = 70  ;;  %374 = vst [vmem:[#allocation2 + $0x10] sm:$0xff] (!%p1283_p12), %v1705_v16  ;;  %375 = vst [vmem:[#allocation2 + $0x18] sm:$0xff] (!%p1283_p12), %v1705_v16 }
  0x33   : > { %376 = vst [vmem:[#allocation2 + $0x20] sm:$0xff] (!%p1283_p12), %v1705_v16  ;;  %377 = vst [vmem:[#allocation2 + $0x28] sm:$0xff] (!%p1283_p12), %v1705_v16 }
  0x34   : > { %378 = vst [vmem:[#allocation2 + $0x30] sm:$0xff] (!%p1283_p12), %v1705_v16  ;;  %379 = vst [vmem:[#allocation2 + $0x38] sm:$0xff] (!%p1283_p12), %v1705_v16 }
  0x39 PF: > { %v1601_v17 = vld [vmem:[%s1827_s14 + $0x40] sm:$0xff]   ;;  %v1604_v20 = vld [vmem:[%s1827_s14 + $0x48] sm:$0xff]   ;;  %v1607_v23 = vld [vmem:[%s1827_s14 + $0x50] sm:$0xff]   ;;  %p1320_p13 = scmp.ne.s32.totalorder %s1687_s23, 2 }
  0x3a   : > { %v1602_v18 = vld [vmem:[%s1827_s14] sm:$0xff]   ;;  %1413 = vmatprep.subr.bf16.mxu0 %v1601_v17  ;;  %v1605_v21 = vld [vmem:[%s1827_s14 + $0x8] sm:$0xff]   ;;  %v1608_v24 = vld [vmem:[%s1827_s14 + $0x10] sm:$0xff]  }
  0x3b   : > { %v1603_v19 = vld [vmem:[%s1827_s14 + $0x80] sm:$0xff]   ;;  %1414 = vmatpush3.bf16.msra.mxu0 %v1602_v18  ;;  %v1606_v22 = vld [vmem:[%s1827_s14 + $0x88] sm:$0xff]   ;;  %v1609_v25 = vld [vmem:[%s1827_s14 + $0x90] sm:$0xff]  }
  0x3c   : > { %1477 = vmatprep.subr.bf16.mxu1 %v1603_v19  ;;  %1415 = vmatprep.subr.bf16.mxu0 %v1604_v20  ;;  %v1610_v26 = vld [vmem:[%s1827_s14 + $0x58] sm:$0xff]   ;;  %v1613_v29 = vld [vmem:[%s1827_s14 + $0x60] sm:$0xff]   ;;  %v1616_v32 = vld [vmem:[%s1827_s14 + $0x68] sm:$0xff]  }
  0x3d   : > { %1478 = vmatpush3.bf16.msra.mxu1 %v1603_v19  ;;  %v1611_v27 = vld [vmem:[%s1827_s14 + $0x18] sm:$0xff]   ;;  %v1615_v30 = vld [vmem:[%s1827_s14 + $0xa0] sm:$0xff]   ;;  %v1618_v33 = vld [vmem:[%s1827_s14 + $0xa8] sm:$0xff]  }
  0x3e   : > { %1479 = vmatprep.subr.bf16.mxu1 %v1606_v22  ;;  %v1612_v28 = vld [vmem:[%s1827_s14 + $0x98] sm:$0xff]   ;;  %v1614_v31 = vld [vmem:[%s1827_s14 + $0x20] sm:$0xff]   ;;  %v1617_v34 = vld [vmem:[%s1827_s14 + $0x28] sm:$0xff]  }
  0x3f   : > { %1416 = vmatpush3.bf16.msra.mxu0 %v1605_v21  ;;  %v1619_v35 = vld [vmem:[%s1827_s14 + $0x70] sm:$0xff]   ;;  %v1622_v38 = vld [vmem:[%s1827_s14 + $0x78] sm:$0xff]   ;;  %v1625_v43 = vld [vmem:[%s1839_s20] ss:$12 sps:$4 sm:$0xff]  }
  0x40   : > { %1417 = vmatprep.subr.bf16.mxu0 %v1607_v23  ;;  %v1620_v36 = vld [vmem:[%s1827_s14 + $0x30] sm:$0xff]   ;;  %v1624_v39 = vld [vmem:[%s1827_s14 + $0xb8] sm:$0xff]   ;;  %v1629_v45 = vld [vmem:[%s1839_s20 + $0x20] ss:$12 sps:$4 sm:$0xff]  }
  0x41   : > { %1480 = vmatpush3.bf16.msra.mxu1 %v1606_v22  ;;  %v1621_v37 = vld [vmem:[%s1827_s14 + $0xb0] sm:$0xff]   ;;  %v1623_v42 = vld [vmem:[%s1827_s14 + $0x38] sm:$0xff]   ;;  %v380_v59 = vld [vmem:[#allocation2] sm:$0xff] }
  0x42   : > { %1481 = vmatprep.subr.bf16.mxu1 %v1609_v25  ;;  %v1627_v40 = vld [vmem:[%s1839_s20 + $0x4] ss:$12 sps:$4 sm:$0xff]   ;;  %v1628_v41 = vld [vmem:[%s1839_s20 + $0x8] ss:$12 sps:$4 sm:$0xff]   ;;  %v1638_v51 = vld [vmem:[%s1839_s20 + $0x4c] ss:$12 sps:$4 sm:$0xff]  }
  0x43   : > { %1418 = vmatpush3.bf16.msra.mxu0 %v1608_v24  ;;  %692 = vmatprep.mubr.bf16.mxu0 %v1627_v40  ;;  %v1630_v44 = vld [vmem:[%s1839_s20 + $0x1c] ss:$12 sps:$4 sm:$0xff]   ;;  %v1636_v46 = vld [vmem:[%s1839_s20 + $0x38] ss:$12 sps:$4 sm:$0xff]   ;;  %v1633_v48 = vld [vmem:[%s1839_s20 + $0x34] ss:$12 sps:$4 sm:$0xff]  }
  0x44   : > { %1419 = vmatprep.subr.bf16.mxu0 %v1610_v26  ;;  %1493 = vmatprep.mubr.bf16.mxu1 %v1628_v41  ;;  %v1632_v47 = vld [vmem:[%s1839_s20 + $0x18] ss:$12 sps:$4 sm:$0xff]   ;;  %v1637_v49 = vld [vmem:[%s1839_s20 + $0x50] ss:$12 sps:$4 sm:$0xff]   ;;  %v1640_v52 = vld [vmem:[%s1839_s20 + $0x48] ss:$12 sps:$4 sm:$0xff]  }
  0x45   : > { %1482 = vmatpush3.bf16.msra.mxu1 %v1609_v25  ;;  %v1635_v50 = vld [vmem:[%s1839_s20 + $0x30] ss:$12 sps:$4 sm:$0xff]   ;;  %v381_v0 = vld [vmem:[#allocation2 + $0x8] sm:$0xff]  ;;  %v384_v26 = vld [vmem:[#allocation2 + $0x20] sm:$0xff] }
  0x46   : > { %1483 = vmatprep.subr.bf16.mxu1 %v1612_v28  ;;  %v382_v10 = vld [vmem:[#allocation2 + $0x10] sm:$0xff]  ;;  %v383_v16 = vld [vmem:[#allocation2 + $0x18] sm:$0xff] }
  0x47   : > { %1420 = vmatpush3.bf16.msra.mxu0 %v1611_v27  ;;  %v387_v41 = vld [vmem:[#allocation2 + $0x38] sm:$0xff] }
  0x48   : > { %1421 = vmatprep.subr.bf16.mxu0 %v1613_v29  ;;  %v385_v29 = vld [vmem:[#allocation2 + $0x28] sm:$0xff] }
  0x49   : > { %1484 = vmatpush3.bf16.msra.mxu1 %v1612_v28 }
  0x4a   : > { %1485 = vmatprep.subr.bf16.mxu1 %v1615_v30 }
  0x4b   : > { %1422 = vmatpush3.bf16.msra.mxu0 %v1614_v31 }
  0x4c   : > { %1423 = vmatprep.subr.bf16.mxu0 %v1616_v32 }
  0x4d   : > { %1486 = vmatpush3.bf16.msra.mxu1 %v1615_v30 }
  0x4e   : > { %1487 = vmatprep.subr.bf16.mxu1 %v1618_v33 }
  0x4f   : > { %1424 = vmatpush3.bf16.msra.mxu0 %v1617_v34 }
  0x50   : > { %1425 = vmatprep.subr.bf16.mxu0 %v1619_v35 }
  0x51   : > { %1488 = vmatpush3.bf16.msra.mxu1 %v1618_v33 }
  0x52   : > { %1489 = vmatprep.subr.bf16.mxu1 %v1621_v37 }
  0x53   : > { %1426 = vmatpush3.bf16.msra.mxu0 %v1620_v36 }
  0x54   : > { %1427 = vmatprep.subr.bf16.mxu0 %v1622_v38 }
  0x55   : > { %1490 = vmatpush3.bf16.msra.mxu1 %v1621_v37  ;;  %v386_v37 = vld [vmem:[#allocation2 + $0x30] sm:$0xff] }
  0x56   : > { %1491 = vmatprep.subr.bf16.mxu1 %v1624_v39 }
  0x57   : > { %1428 = vmatpush3.bf16.msra.mxu0 %v1623_v42 }
  0x59   : > { %1492 = vmatpush3.bf16.msra.mxu1 %v1624_v39 }
  0x5a   : > { %693 = vmatmul.mubr.bf16.vlgmr.msra.gmra.mrb[0].mxu0 %v1625_v43 }
  0x5b   : > { %700 = vmatprep.mubr.bf16.mxu0 %v1630_v44 }
  0x5c   : > { %1494 = vmatmul.mubr.bf16.vlgmr.msra.gmra.mrb[0].mxu1 %v1629_v45  ;;  %v1641_v45 = vld [vmem:[%s1949_s3] sm:$0xff] (!%p1320_p13)  }
  0x5d   : > { %1497 = vmatprep.mubr.bf16.mxu1 %v1636_v46  ;;  %v1642_v46 = vld [vmem:[%s1949_s3 + $0x8] sm:$0xff] (!%p1320_p13)   ;;  %1501 = vmatprep.subr.bf16.mxu0 (!%p1320_p13), %v1641_v45 }
  0x5e   : > { %1525 = vmatprep.subr.bf16.mxu1 (!%p1320_p13), %v1641_v45  ;;  %1502 = vmatpush3.bf16.msra.mxu0 (!%p1320_p13), %v1641_v45 }
  0x5f   : > { %1533 = vmatpush3.bf16.msra.mxu1 (!%p1320_p13), %v1641_v45  ;;  %1503 = vmatprep.subr.bf16.mxu0 (!%p1320_p13), %v1642_v46 }
  0x60   : > { %1526 = vmatprep.subr.bf16.mxu1 (!%p1320_p13), %v1642_v46 }
  0x62   : > { %701 = vmatmul.mubr.bf16.gmra.mrb[4].mxu0 %v1632_v47  ;;  %v1643_v47 = vld [vmem:[%s1949_s3 + $0x10] sm:$0xff] (!%p1320_p13)  }
  0x63   : > { %708 = vmatprep.mubr.bf16.mxu0 %v1633_v48  ;;  %1504 = vmatpush3.bf16.msra.mxu0 (!%p1320_p13), %v1642_v46  ;;  %v1644_v48 = vld [vmem:[%s1949_s3 + $0x18] sm:$0xff] (!%p1320_p13)  }
  0x64   : > { %1498 = vmatmul.mubr.bf16.gmra.mrb[4].mxu1 %v1637_v49  ;;  %1505 = vmatprep.subr.bf16.mxu0 (!%p1320_p13), %v1643_v47 }
  0x65   : > { %1534 = vmatpush3.bf16.msra.mxu1 (!%p1320_p13), %v1642_v46 }
  0x66   : > { %1527 = vmatprep.subr.bf16.mxu1 (!%p1320_p13), %v1643_v47 }
  0x67   : > { %1506 = vmatpush3.bf16.msra.mxu0 (!%p1320_p13), %v1643_v47 }
  0x68   : > { %1507 = vmatprep.subr.bf16.mxu0 (!%p1320_p13), %v1644_v48 }
  0x69   : > { %1535 = vmatpush3.bf16.msra.mxu1 (!%p1320_p13), %v1643_v47 }
  0x6a   : > { %709 = vmatmul.mubr.bf16.gmra.mrb[8].mxu0 %v1635_v50  ;;  %1528 = vmatprep.subr.bf16.mxu1 (!%p1320_p13), %v1644_v48 }
  0x6b   : > { %716 = vmatprep.mubr.bf16.mxu0 %v1638_v51  ;;  %v1321_v51 = vld [vmem:[%s1948_s2] ss:$0 sm:$0xff] (!%p1320_p13)  ;;  %1508 = vmatpush3.bf16.msra.mxu0 (!%p1320_p13), %v1644_v48 }
  0x6d   : > { %1536 = vmatpush3.bf16.msra.mxu1 (!%p1320_p13), %v1644_v48 }
  0x72   : > { %717 = vmatmul.mubr.bf16.gmra.mrb[12].mxu0 %v1640_v52 }
 0x12d   : > { %v1429_v53 = vpop.f32.mrb[0].mxu0 }
 0x12e   : > { %v1430_v54 = vpop.f32.mrb[1].mxu0 }
 0x12f   : > { %v1431_v55 = vadd.f32 %v1430_v54, %v1429_v53  ;;  %v1432_v56 = vpop.f32.mrb[2].mxu0  ;;  %v1495_v57 = vpop.f32.mrb[0].mxu1  ;;  %v1322_v54 = vld [vmem:[%s1948_s2 + $0x1] ss:$0 sm:$0xff] (!%p1320_p13) }
 0x130   : > { %v1433_v58 = vpop.f32.mrb[3].mxu0  ;;  %v759_v60 = vpop.f32.mrb[1].mxu1 }
 0x131   : > { %v1434_v61 = vadd.f32 %v1433_v58, %v1432_v56  ;;  %v760_v62 = vadd.f32 %v1431_v55, %v759_v60  ;;  %v1496_v63 = vpop.f32.mrb[2].mxu1 }
 0x132   : > { %v762_v1 = vpop.f32.mrb[3].mxu1 }
 0x133   : > { %v790_v2 = vadd.f32 %v760_v62, %v380_v59  ;;  %v763_v3 = vadd.f32 %v1434_v61, %v762_v1 }
 0x135   : > { %798 = vst [vmem:[#allocation2] sm:$0xff] %v790_v2  ;;  %v791_v4 = vadd.f32 %v763_v3, %v381_v0  ;;  %v1435_v5 = vpop.f32.mrb[4].mxu0  ;;  %v1645_v0 = vld [vmem:[%s1949_s3 + $0x20] sm:$0xff] (!%p1320_p13)  }
 0x136   : > { %v1436_v6 = vpop.f32.mrb[5].mxu0  ;;  %1509 = vmatprep.subr.bf16.mxu0 (!%p1320_p13), %v1645_v0  ;;  %1529 = vmatprep.subr.bf16.mxu1 (!%p1320_p13), %v1645_v0 }
 0x137   : > { %799 = vst [vmem:[#allocation2 + $0x8] sm:$0xff] %v791_v4  ;;  %v1437_v7 = vadd.f32 %v1436_v6, %v1435_v5  ;;  %v1438_v8 = vpop.f32.mrb[6].mxu0  ;;  %v1499_v9 = vpop.f32.mrb[4].mxu1  ;;  %1510 = vmatpush3.bf16.msra.mxu0 (!%p1320_p13), %v1645_v0  ;;  %1537 = vmatpush3.bf16.msra.mxu1 (!%p1320_p13), %v1645_v0 }
 0x138   : > { %v1439_v11 = vpop.f32.mrb[7].mxu0  ;;  %v775_v12 = vpop.f32.mrb[5].mxu1 }
 0x139   : > { %v768_v13 = vadd.f32 %v1495_v57, %v1437_v7  ;;  %v1440_v14 = vadd.f32 %v1439_v11, %v1438_v8  ;;  %v1500_v15 = vpop.f32.mrb[6].mxu1 }
 0x13a   : > { %v778_v17 = vpop.f32.mrb[7].mxu1 }
 0x13b   : > { %v792_v18 = vadd.f32 %v768_v13, %v382_v10  ;;  %v771_v19 = vadd.f32 %v1496_v63, %v1440_v14  ;;  %v1646_v13 = vld [vmem:[%s1949_s3 + $0x28] sm:$0xff] (!%p1320_p13)  }
 0x13c   : > { %v810_v49 = vld [vmem:[#allocation2] sm:$0xff] (!%p1320_p13)  ;;  %1511 = vmatprep.subr.bf16.mxu0 (!%p1320_p13), %v1646_v13  ;;  %1530 = vmatprep.subr.bf16.mxu1 (!%p1320_p13), %v1646_v13 }
 0x13d   : > { %800 = vst [vmem:[#allocation2 + $0x10] sm:$0xff] %v792_v18  ;;  %v793_v20 = vadd.f32 %v771_v19, %v383_v16  ;;  %v1441_v21 = vpop.f32.mrb[8].mxu0  ;;  %v823_v52 = vmul.f32 (!%p1320_p13), %v1321_v51, %v810_v49  ;;  %1512 = vmatpush3.bf16.msra.mxu0 (!%p1320_p13), %v1646_v13  ;;  %1538 = vmatpush3.bf16.msra.mxu1 (!%p1320_p13), %v1646_v13 }
 0x13e   : > { %v1442_v22 = vpop.f32.mrb[9].mxu0  ;;  %v811_v50 = vld [vmem:[#allocation2 + $0x8] sm:$0xff] (!%p1320_p13) }
 0x13f   : > { %801 = vst [vmem:[#allocation2 + $0x18] sm:$0xff] %v793_v20  ;;  %v1443_v23 = vadd.f32 %v1442_v22, %v1441_v21  ;;  %v1444_v24 = vpop.f32.mrb[10].mxu0  ;;  %v824_v53 = vmul.f32 (!%p1320_p13), %v1321_v51, %v811_v50  ;;  %v836_v61 = vadd.f32 (!%p1320_p13), %v1322_v54, %v823_v52 }
 0x140   : > { %v1445_v25 = vpop.f32.mrb[11].mxu0 }
 0x141   : > { %v1446_v27 = vadd.f32 %v1445_v25, %v1444_v24  ;;  %v776_v28 = vadd.f32 %v1443_v23, %v775_v12  ;;  %v837_v62 = vadd.f32 (!%p1320_p13), %v1322_v54, %v824_v53  ;;  %vm844_vm0 = vcmp.gt.f32.partialorder (!%p1320_p13), %v836_v61, 0.0  ;;  %v1647_v24 = vld [vmem:[%s1949_s3 + $0x30] sm:$0xff] (!%p1320_p13)  }
 0x142   : > { %v852_v4 = vmul.f32 (!%p1320_p13), 0.1, %v836_v61  ;;  %1513 = vmatprep.subr.bf16.mxu0 (!%p1320_p13), %v1647_v24  ;;  %1531 = vmatprep.subr.bf16.mxu1 (!%p1320_p13), %v1647_v24 }
 0x143   : > { %v794_v30 = vadd.f32 %v776_v28, %v384_v26  ;;  %v779_v31 = vadd.f32 %v1446_v27, %v778_v17  ;;  %vm845_vm1 = vcmp.gt.f32.partialorder (!%p1320_p13), %v837_v62, 0.0  ;;  %v853_v5 = vmul.f32 (!%p1320_p13), 0.1, %v837_v62  ;;  %1514 = vmatpush3.bf16.msra.mxu0 (!%p1320_p13), %v1647_v24  ;;  %1539 = vmatpush3.bf16.msra.mxu1 (!%p1320_p13), %v1647_v24 }
 0x144   : > { %v812_v59 = vld [vmem:[#allocation2 + $0x10] sm:$0xff] (!%p1320_p13)  ;;  %v860_v8 = vsel (!%p1320_p13), %vm844_vm0, %v836_v61, %v852_v4 }
 0x145   : > { %802 = vst [vmem:[#allocation2 + $0x20] sm:$0xff] %v794_v30  ;;  %v795_v32 = vadd.f32 %v779_v31, %v385_v29  ;;  %v1447_v33 = vpop.f32.mrb[12].mxu0  ;;  %v825_v63 = vmul.f32 (!%p1320_p13), %v1321_v51, %v812_v59  ;;  %v1648_v31 = vld [vmem:[%s1949_s3 + $0x38] sm:$0xff] (!%p1320_p13)  }
 0x146   : > { %v1448_v34 = vpop.f32.mrb[13].mxu0  ;;  %v813_v60 = vld [vmem:[#allocation2 + $0x18] sm:$0xff] (!%p1320_p13)  ;;  %1515 = vmatprep.subr.bf16.mxu0 (!%p1320_p13), %v1648_v31  ;;  %1532 = vmatprep.subr.bf16.mxu1 (!%p1320_p13), %v1648_v31 }
 0x147   : > { %803 = vst [vmem:[#allocation2 + $0x28] sm:$0xff] %v795_v32  ;;  %v1449_v35 = vadd.f32 %v1448_v34, %v1447_v33  ;;  %v1450_v36 = vpop.f32.mrb[14].mxu0  ;;  %v826_v3 = vmul.f32 (!%p1320_p13), %v1321_v51, %v813_v60  ;;  %v838_v10 = vadd.f32 (!%p1320_p13), %v1322_v54, %v825_v63  ;;  %1516 = vmatpush3.bf16.msra.mxu0 (!%p1320_p13), %v1648_v31 }
 0x148   : > { %v1451_v38 = vpop.f32.mrb[15].mxu0  ;;  %1540 = vmatpush3.bf16.msra.mxu1 (!%p1320_p13), %v1648_v31 }
 0x149   : > { %v784_v39 = vadd.f32 %v1499_v9, %v1449_v35  ;;  %v1452_v40 = vadd.f32 %v1451_v38, %v1450_v36  ;;  %809 = sbr.rel (%p1320_p13) target bundleno = 577 (0x241), region = 74  ;;  %v861_v9 = vsel (!%p1320_p13), %vm845_vm1, %v837_v62, %v853_v5  ;;  %v839_v18 = vadd.f32 (!%p1320_p13), %v1322_v54, %v826_v3  ;;  %v1339_v35 = vld [vmem:[%s1950_s4] ss:$0 sm:$0xff] (!%p1320_p13) }
 0x14a   : > { %v868_v14 = vpack.c.bf16 (!%p1320_p13), %v861_v9, %v860_v8  ;;  %vm846_vm4 = vcmp.gt.f32.partialorder (!%p1320_p13), %v838_v10, 0.0  ;;  %v854_v19 = vmul.f32 (!%p1320_p13), 0.1, %v838_v10 }
 0x14b   : > { %v796_v42 = vadd.f32 %v784_v39, %v386_v37  ;;  %v787_v43 = vadd.f32 %v1500_v15, %v1452_v40  ;;  %vm847_vm5 = vcmp.gt.f32.partialorder (!%p1320_p13), %v839_v18, 0.0  ;;  %v855_v22 = vmul.f32 (!%p1320_p13), 0.1, %v839_v18  ;;  %v1340_v37 = vld [vmem:[%s1950_s4 + $0x1] ss:$0 sm:$0xff] (!%p1320_p13) }
 0x14c   : > { %v814_v55 = vld [vmem:[#allocation2 + $0x20] sm:$0xff] (!%p1320_p13)  ;;  %1371 = vst [vmem:[%s1832_s18] sm:$0xff] (!%p1320_p13), %v868_v14   ;;  %1517 = vmatprep.mubr.bf16.mxu0 (!%p1320_p13), %v868_v14  ;;  %v862_v23 = vsel (!%p1320_p13), %vm846_vm4, %v838_v10, %v854_v19 }
 0x14d   : > { %804 = vst [vmem:[#allocation2 + $0x30] sm:$0xff] %v796_v42  ;;  %v797_v44 = vadd.f32 %v787_v43, %v387_v41  ;;  %v827_v57 = vmul.f32 (!%p1320_p13), %v1321_v51, %v814_v55  ;;  %v863_v27 = vsel (!%p1320_p13), %vm847_vm5, %v839_v18, %v855_v22 }
 0x14e   : > { %v815_v56 = vld [vmem:[#allocation2 + $0x28] sm:$0xff] (!%p1320_p13)  ;;  %v869_v28 = vpack.c.bf16 (!%p1320_p13), %v863_v27, %v862_v23 }
 0x14f   : > { %805 = vst [vmem:[#allocation2 + $0x38] sm:$0xff] %v797_v44  ;;  %v828_v58 = vmul.f32 (!%p1320_p13), %v1321_v51, %v815_v56  ;;  %v840_v1 = vadd.f32 (!%p1320_p13), %v1322_v54, %v827_v57 }
 0x150   : > { %1407 = vst [vmem:[%s1832_s18 + $0x8] sm:$0xff] %v869_v28   ;;  %1518 = vmatmul.mubr.bf16.vlgmr.msra.gmra.mrb[0].mxu0 %v869_v28 }
 0x151   : > { %v841_v2 = vadd.f32 %v1322_v54, %v828_v58  ;;  %vm848_vm2 = vcmp.gt.f32.partialorder %v840_v1, 0.0  ;;  %v856_v6 = vmul.f32 0.1, %v840_v1 }
 0x153   : > { %vm849_vm3 = vcmp.gt.f32.partialorder %v841_v2, 0.0  ;;  %v857_v7 = vmul.f32 0.1, %v841_v2  ;;  %v864_v15 = vsel %vm848_vm2, %v840_v1, %v856_v6 }
 0x154   : > { %v816_v11 = vld [vmem:[#allocation2 + $0x30] sm:$0xff] }
 0x155   : > { %v865_v16 = vsel %vm849_vm3, %v841_v2, %v857_v7  ;;  %v829_v20 = vmul.f32 %v1321_v51, %v816_v11 }
 0x156   : > { %v817_v12 = vld [vmem:[#allocation2 + $0x38] sm:$0xff]  ;;  %v870_v17 = vpack.c.bf16 %v865_v16, %v864_v15 }
 0x157   : > { %v830_v21 = vmul.f32 %v1321_v51, %v817_v12  ;;  %v842_v25 = vadd.f32 %v1322_v54, %v829_v20 }
 0x158   : > { %1408 = vst [vmem:[%s1832_s18 + $0x10] sm:$0xff] %v870_v17   ;;  %1521 = vmatprep.mubr.bf16.mxu1 %v870_v17 }
 0x159   : > { %v843_v26 = vadd.f32 %v1322_v54, %v830_v21  ;;  %vm850_vm6 = vcmp.gt.f32.partialorder %v842_v25, 0.0  ;;  %v858_v29 = vmul.f32 0.1, %v842_v25 }
 0x15b   : > { %vm851_vm7 = vcmp.gt.f32.partialorder %v843_v26, 0.0  ;;  %v859_v30 = vmul.f32 0.1, %v843_v26  ;;  %v866_v32 = vsel %vm850_vm6, %v842_v25, %v858_v29 }
 0x15d   : > { %v867_v33 = vsel %vm851_vm7, %v843_v26, %v859_v30 }
 0x15e   : > { %v871_v34 = vpack.c.bf16 %v867_v33, %v866_v32 }
 0x160   : > { %1409 = vst [vmem:[%s1832_s18 + $0x18] sm:$0xff] %v871_v34   ;;  %1522 = vmatmul.mubr.bf16.vlgmr.msra.gmra.mrb[0].mxu1 %v871_v34 }
 0x223   : > { %v1519_v36 = vpop.f32.mrb[0].mxu0 }
 0x224   : > { %v1044_v39 = vmul.f32 %v1519_v36, %v1339_v35  ;;  %v1006_v41 = vpop.f32.mrb[1].mxu0 }
 0x225   : > { %v1042_v43 = vmul.f32 %v1339_v35, %v1006_v41  ;;  %v1520_v45 = vpop.f32.mrb[2].mxu0 }
 0x226   : > { %v1057_v47 = vadd.f32 %v1340_v37, %v1044_v39  ;;  %v1045_v49 = vmul.f32 %v1520_v45, %v1339_v35  ;;  %v1009_v51 = vpop.f32.mrb[3].mxu0 }
 0x227   : > { %v1055_v53 = vadd.f32 %v1340_v37, %v1042_v43  ;;  %v1043_v55 = vmul.f32 %v1339_v35, %v1009_v51 }
 0x228   : > { %vm1065_vm8 = vcmp.gt.f32.partialorder %v1057_v47, 0.0  ;;  %v1073_v57 = vmul.f32 0.1, %v1057_v47  ;;  %v1058_v61 = vadd.f32 %v1340_v37, %v1045_v49 }
 0x229   : > { %vm1063_vm10 = vcmp.gt.f32.partialorder %v1055_v53, 0.0  ;;  %v1071_v59 = vmul.f32 0.1, %v1055_v53  ;;  %v1056_v1 = vadd.f32 %v1340_v37, %v1043_v55 }
 0x22a   : > { %v1081_v63 = vsel %vm1065_vm8, %v1057_v47, %v1073_v57  ;;  %vm1066_vm12 = vcmp.gt.f32.partialorder %v1058_v61, 0.0  ;;  %v1074_v3 = vmul.f32 0.1, %v1058_v61 }
 0x22b   : > { %vm1064_vm14 = vcmp.gt.f32.partialorder %v1056_v1, 0.0  ;;  %v1072_v5 = vmul.f32 0.1, %v1056_v1  ;;  %v1079_v7 = vsel %vm1063_vm10, %v1055_v53, %v1071_v59 }
 0x22c   : > { %v1082_v9 = vsel %vm1066_vm12, %v1058_v61, %v1074_v3 }
 0x22d   : > { %v1395_v11 = vpack.c.bf16 %v1082_v9, %v1081_v63  ;;  %v1080_v13 = vsel %vm1064_vm14, %v1056_v1, %v1072_v5 }
 0x22e   : > { %v1390_v15 = vpack.c.bf16 %v1080_v13, %v1079_v7 }
 0x22f   : > { %1410 = vst [vmem:[%s1837_s24 + $0x8] sm:$0xff] %v1395_v11  }
 0x230   : > { %1391 = vst [vmem:[%s1837_s24] sm:$0xff] %v1390_v15  }
 0x233   : > { %v1523_v38 = vpop.f32.mrb[0].mxu1 }
 0x234   : > { %v1048_v40 = vmul.f32 %v1523_v38, %v1339_v35  ;;  %v1022_v42 = vpop.f32.mrb[1].mxu1 }
 0x235   : > { %v1046_v44 = vmul.f32 %v1339_v35, %v1022_v42  ;;  %v1524_v46 = vpop.f32.mrb[2].mxu1 }
 0x236   : > { %v1061_v48 = vadd.f32 %v1340_v37, %v1048_v40  ;;  %v1049_v50 = vmul.f32 %v1524_v46, %v1339_v35  ;;  %v1025_v52 = vpop.f32.mrb[3].mxu1 }
 0x237   : > { %v1059_v54 = vadd.f32 %v1340_v37, %v1046_v44  ;;  %v1047_v56 = vmul.f32 %v1339_v35, %v1025_v52 }
 0x238   : > { %vm1069_vm9 = vcmp.gt.f32.partialorder %v1061_v48, 0.0  ;;  %v1077_v58 = vmul.f32 0.1, %v1061_v48  ;;  %v1062_v62 = vadd.f32 %v1340_v37, %v1049_v50 }
 0x239   : > { %vm1067_vm11 = vcmp.gt.f32.partialorder %v1059_v54, 0.0  ;;  %v1075_v60 = vmul.f32 0.1, %v1059_v54  ;;  %v1060_v2 = vadd.f32 %v1340_v37, %v1047_v56 }
 0x23a   : > { %v1085_v0 = vsel %vm1069_vm9, %v1061_v48, %v1077_v58  ;;  %vm1070_vm13 = vcmp.gt.f32.partialorder %v1062_v62, 0.0  ;;  %v1078_v4 = vmul.f32 0.1, %v1062_v62 }
 0x23b   : > { %vm1068_vm15 = vcmp.gt.f32.partialorder %v1060_v2, 0.0  ;;  %v1076_v6 = vmul.f32 0.1, %v1060_v2  ;;  %v1083_v8 = vsel %vm1067_vm11, %v1059_v54, %v1075_v60 }
 0x23c   : > { %v1086_v10 = vsel %vm1070_vm13, %v1062_v62, %v1078_v4 }
 0x23d   : > { %v1405_v12 = vpack.c.bf16 %v1086_v10, %v1085_v0  ;;  %v1084_v14 = vsel %vm1068_vm15, %v1060_v2, %v1076_v6 }
 0x23e   : > { %v1400_v16 = vpack.c.bf16 %v1084_v14, %v1083_v8 }
 0x23f   : > { %1412 = vst [vmem:[%s1837_s24 + $0x18] sm:$0xff] %v1405_v12  }
 0x240   : > { %1411 = vst [vmem:[%s1837_s24 + $0x10] sm:$0xff] %v1400_v16  }
 0x241 PF: > { %s17_s27 = sadd.s32 1, %s1703_s27   ;;  %s1953_s21 = smov %s1683_s22 }
 0x242   : > { %p14_p0 = scmp.ge.s32.totalorder %s17_s27, 8   ;;  %s1954_s22 = smov %s1792_s10 }
 0x243   : > { %s1955_s23 = smov %s1695_s25  ;;  %s1956_s24 = smov %s1699_s26 }
 0x244   : > { %s1957_s25 = smov %s1960_s28  ;;  %s1958_s26 = smov %s1964_s29 }
 0x245   :  { %16 = sbr.rel (!%p14_p0) target bundleno = 4 (0x4), region = 130 }

// kernel: _forward_impl.6
= control target key start
LH: loop header
LB: loop body
LE: loop exit
PB: predicated region body
PF: predicated region fallthrough
CT: control target
= control target key end

     0   :  { %s1036_s12 = smov 0   ;;  %s1038_s13 = smov 0   ;;  %s1170_s0 = inlined_call_operand.vmem [shape: bf16[32,1152], index: 0, kind: input, shape index: {}]   ;;  %s1171_s1 = inlined_call_operand.vmem [shape: bf16[1152,128], index: 1, kind: input, shape index: {}]   ;;  %s1172_s2 = inlined_call_operand.vmem [shape: f32[2,128], index: 2, kind: input, shape index: {}]   ;;  %s1173_s3 = inlined_call_operand.vmem [shape: bf16[32,128], index: 3, kind: output, shape index: {}]  }
   0x1   :  { %s1040_s14 = smov 0   ;;  %s1042_s15 = smov 0  }
   0x2   :  { %s1044_s16 = smov 0   ;;  %s1046_s17 = smov 0  }
   0x3   :  { %s1048_s18 = smov 0  }
   0x4 LB: > { %s25_s19 = sadd.s32 1, %s1003_s16  ;;  %s32_s20 = sadd.s32 1, %s1007_s17  ;;  %s1011_s18 = sphi %s1048_s18, %s13_s18   ;;  %s1007_s17 = sphi %s1046_s17, %s1179_s17   ;;  %s1003_s16 = sphi %s1044_s16, %s1178_s16   ;;  %s999_s15 = sphi %s1042_s15, %s1177_s15   ;;  %s995_s14 = sphi %s1040_s14, %s1176_s14   ;;  %s991_s13 = sphi %s1038_s13, %s1175_s13   ;;  %s987_s12 = sphi %s1036_s12, %s1174_s12  }
   0x5   : > { %p26_p0 = scmp.ge.s32.totalorder %s25_s19, 3  ;;  %p48_p1 = scmp.ne.s32.totalorder %s991_s13, %s987_s12 }
   0x6   : > { %p49_p2 = scmp.eq.s32.totalorder %s1011_s18, 0  ;;  %s41_s24 = sadd.s32 1, %s991_s13 }
   0x7   : > { %s1181_s19 = smov (%p26_p0, %s25_s19), 0  ;;  %s1183_s20 = smov (!%p26_p0, %s32_s20), %s1007_s17 }
   0x8   : > { %p50_p3 = por %p49_p2, %p48_p1  ;;  %p34_p4 = scmp.ge.s32.totalorder %s1183_s20, 2 }
   0x9   : > { %s37_s21 = ssub.s32 %s1003_s16, %s1181_s19  ;;  %p762_p6 = scmp.ge.s32.totalorder %s1011_s18, 6 }
   0xa   : > { %s1185_s20 = smov (%p34_p4, %s1183_s20), 0 }
   0xb   : > { %s36_s22 = ssub.s32 %s1007_s17, %s1185_s20  ;;  %163 = sbr.rel (%p762_p6) target bundleno = 29 (0x1d), region = 20 }
   0xc   : > { %s38_s23 = sor.u32 %s37_s21, %s36_s22 }
   0xd   : > { %p39_p5 = scmp.eq.s32.totalorder %s38_s23, 0 }
   0xf   : > { %s1087_s25 = scalar_select %p39_p5, %s991_s13, %s41_s24  }
  0x12   : > { %166 = sbr.rel (!%p50_p3) target bundleno = 29 (0x1d), region = 24  ;;  %s168_s26 = sand.u32 (%p50_p3), 1, %s991_s13  }
  0x13   : > { %s172_s27 = smul.u32 (%p50_p3), 3, %s1003_s16 }
  0x14   : > { %s867_s28 = smul.u32 (%p50_p3), 24, %s168_s26 }
  0x15   : > { %s868_s29 = smul.u32 (%p50_p3), 18, %s1007_s17 }
  0x16   : > { %s170_s8 = scalar_lea.vmem (%p50_p3), [#allocation3], %s867_s28 }
  0x17   : > { %s174_s30 = sadd.s32 (%p50_p3), %s868_s29, %s172_s27 }
  0x18   : > { %s765_s4 = sshll.u32 (%p50_p3), %s174_s30, 2 }
  0x19   : > { %s176_s7 = scalar_lea.vmem %s1170_s0, %s765_s4 }
  0x1a   : > { %v191_v0 = vld [vmem:[%s176_s7] sm:$0xff]  ;;  %v766_v2 = vld [vmem:[%s176_s7 + $0x8] sm:$0xf]  ;;  %v768_v3 = vld [vmem:[%s176_s7 + $0x2c] sm:$0xf] }
  0x1b   : > { %v193_v1 = vld [vmem:[%s176_s7 + $0x24] sm:$0xff]  ;;  %192 = vst [vmem:[%s170_s8] sm:$0xff] %v191_v0  ;;  %767 = vst [vmem:[%s170_s8 + $0x8] sm:$0xf] %v766_v2 }
  0x1c   : > { %194 = vst [vmem:[%s170_s8 + $0xc] sm:$0xff] %v193_v1  ;;  %769 = vst [vmem:[%s170_s8 + $0x14] sm:$0xf] %v768_v3 }
  0x1d PF: > { %p770_p7 = scmp.ge.s32.totalorder %s1011_s18, 1  ;;  %p222_p8 = scmp.lt.s32.totalorder %s1011_s18, 7 }
  0x1f   : > { %p223_p9 = pnand %p770_p7, %p222_p8 }
  0x20   : > { %s229_s9 = sand.u32 (!%p223_p9), 1, %s987_s12   ;;  %s269_s10 = smul.u32 (!%p223_p9), 48, %s995_s14 }
  0x21   : > { %226 = sbr.rel (%p223_p9) target bundleno = 322 (0x142), region = 54  ;;  %s772_s21 = sshll.u32 (!%p223_p9), %s999_s15, 1 }
  0x22   : > { %s869_s11 = smul.u32 (!%p223_p9), 24, %s229_s9  ;;  %p270_p10 = scmp.lt.s32.totalorder (!%p223_p9), %s269_s10, 143 }
  0x23   : > { %p283_p11 = scmp.lt.s32.totalorder (!%p223_p9), %s772_s21, 3  ;;  %p774_p12 = scmp.ne.s32.totalorder (!%p223_p9), %s995_s14, 0 }
  0x24   : > { %s1111_s12 = scalar_lea.vmem (!%p223_p9), [#allocation3], %s869_s11 }
  0x28   : > { %s1187_s10 = smov (!%p270_p10, %s269_s10), 143  ;;  %s1189_s21 = smov (!%p283_p11, %s772_s21), 3 }
  0x29   : > { %s771_s22 = sshll.u32 %s1187_s10, 2  ;;  %s773_s27 = sshll.u32 %s1189_s21, 2  ;;  %v1013_v4 = vmov (!%p774_p12), 0.0  }
  0x2a   : > { %s1104_s26 = scalar_lea.vmem %s1171_s1, %s771_s22  ;;  %s1109_s30 = scalar_lea.vmem %s1173_s3, %s773_s27  ;;  %296 = vst [vmem:[#allocation2] sm:$0xff] (!%p774_p12), %v1013_v4  ;;  %297 = vst [vmem:[#allocation2 + $0x8] sm:$0xff] (!%p774_p12), %v1013_v4 }
  0x2b   : > { %295 = sbr.rel (%p774_p12) target bundleno = 50 (0x32), region = 62 }
  0x32 PF: > { %v929_v5 = vld [vmem:[%s1104_s26 + $0x40] sm:$0xff]   ;;  %v1014_v6 = vmov 0.0   ;;  %vm1015_vm0 = vmmov 0   ;;  %v932_v9 = vld [vmem:[%s1104_s26 + $0x48] sm:$0xff]   ;;  %v935_v12 = vld [vmem:[%s1104_s26 + $0x50] sm:$0xff]   ;;  %p802_p13 = scmp.ne.s32.totalorder %s995_s14, 2 }
  0x33   : > { %847 = vmatprep.subr.bf16.mxu1 %v1014_v6  ;;  %v930_v7 = vld [vmem:[%s1104_s26] sm:$0xff]   ;;  %816 = vmatprep.subr.bf16.mxu0 %v929_v5  ;;  %v933_v10 = vld [vmem:[%s1104_s26 + $0x8] sm:$0xff]   ;;  %v936_v13 = vld [vmem:[%s1104_s26 + $0x10] sm:$0xff]  }
  0x34   : > { %v931_v8 = vld [vmem:[%s1104_s26 + $0x80] sm:$0xff]   ;;  %863 = vmatprep.mubr.msk.bf16.mxu1 %vm1015_vm0, %v1014_v6  ;;  %817 = vmatpush3.bf16.msra.mxu0 %v930_v7  ;;  %v934_v11 = vld [vmem:[%s1104_s26 + $0x88] sm:$0xff]   ;;  %v937_v14 = vld [vmem:[%s1104_s26 + $0x90] sm:$0xff]  }
  0x35   : > { %848 = vmatpush3.bf16.msra.mxu1 %v931_v8  ;;  %818 = vmatprep.subr.bf16.mxu0 %v932_v9  ;;  %v938_v15 = vld [vmem:[%s1104_s26 + $0x58] sm:$0xff]   ;;  %v941_v18 = vld [vmem:[%s1104_s26 + $0x60] sm:$0xff]   ;;  %v944_v21 = vld [vmem:[%s1104_s26 + $0x68] sm:$0xff]  }
  0x36   : > { %849 = vmatprep.subr.bf16.mxu1 %v1014_v6  ;;  %v939_v16 = vld [vmem:[%s1104_s26 + $0x18] sm:$0xff]   ;;  %v942_v19 = vld [vmem:[%s1104_s26 + $0x20] sm:$0xff]   ;;  %v945_v22 = vld [vmem:[%s1104_s26 + $0x28] sm:$0xff]  }
  0x37   : > { %v940_v17 = vld [vmem:[%s1104_s26 + $0x98] sm:$0xff]   ;;  %v943_v20 = vld [vmem:[%s1104_s26 + $0xa0] sm:$0xff]   ;;  %v946_v23 = vld [vmem:[%s1104_s26 + $0xa8] sm:$0xff]  }
  0x38   : > { %819 = vmatpush3.bf16.msra.mxu0 %v933_v10  ;;  %v947_v24 = vld [vmem:[%s1104_s26 + $0x70] sm:$0xff]   ;;  %v950_v27 = vld [vmem:[%s1104_s26 + $0x78] sm:$0xff]   ;;  %v298_v39 = vld [vmem:[#allocation2] sm:$0xff] }
  0x39   : > { %850 = vmatpush3.bf16.msra.mxu1 %v934_v11  ;;  %820 = vmatprep.subr.bf16.mxu0 %v935_v12  ;;  %v948_v25 = vld [vmem:[%s1104_s26 + $0x30] sm:$0xff]   ;;  %v951_v29 = vld [vmem:[%s1104_s26 + $0x38] sm:$0xff]   ;;  %v299_v45 = vld [vmem:[#allocation2 + $0x8] sm:$0xff] }
  0x3a   : > { %851 = vmatprep.subr.bf16.mxu1 %v1014_v6  ;;  %v949_v26 = vld [vmem:[%s1104_s26 + $0xb0] sm:$0xff]   ;;  %v952_v30 = vld [vmem:[%s1104_s26 + $0xb8] sm:$0xff]   ;;  %v803_v51 = vld [vmem:[%s1172_s2] ss:$0 sm:$0xff] (!%p802_p13) }
  0x3b   : > { %v955_v28 = vld [vmem:[%s1111_s12 + $0x4] ss:$12 sps:$4 sm:$0xff]   ;;  %v953_v31 = vld [vmem:[%s1111_s12] ss:$12 sps:$4 sm:$0xff]   ;;  %v956_v32 = vld [vmem:[%s1111_s12 + $0x8] ss:$12 sps:$4 sm:$0xff]  }
  0x3c   : > { %821 = vmatpush3.bf16.msra.mxu0 %v936_v13  ;;  %544 = vmatprep.mubr.bf16.mxu0 %v955_v28  ;;  %v804_v54 = vld [vmem:[%s1172_s2 + $0x1] ss:$0 sm:$0xff] (!%p802_p13) }
  0x3d   : > { %852 = vmatpush3.bf16.msra.mxu1 %v937_v14  ;;  %822 = vmatprep.subr.bf16.mxu0 %v938_v15 }
  0x3e   : > { %853 = vmatprep.subr.bf16.mxu1 %v1014_v6 }
  0x40   : > { %823 = vmatpush3.bf16.msra.mxu0 %v939_v16 }
  0x41   : > { %854 = vmatpush3.bf16.msra.mxu1 %v940_v17  ;;  %824 = vmatprep.subr.bf16.mxu0 %v941_v18 }
  0x42   : > { %855 = vmatprep.subr.bf16.mxu1 %v1014_v6 }
  0x44   : > { %825 = vmatpush3.bf16.msra.mxu0 %v942_v19 }
  0x45   : > { %856 = vmatpush3.bf16.msra.mxu1 %v943_v20  ;;  %826 = vmatprep.subr.bf16.mxu0 %v944_v21 }
  0x46   : > { %857 = vmatprep.subr.bf16.mxu1 %v1014_v6 }
  0x48   : > { %827 = vmatpush3.bf16.msra.mxu0 %v945_v22 }
  0x49   : > { %858 = vmatpush3.bf16.msra.mxu1 %v946_v23  ;;  %828 = vmatprep.subr.bf16.mxu0 %v947_v24 }
  0x4a   : > { %859 = vmatprep.subr.bf16.mxu1 %v1014_v6 }
  0x4c   : > { %829 = vmatpush3.bf16.msra.mxu0 %v948_v25 }
  0x4d   : > { %860 = vmatpush3.bf16.msra.mxu1 %v949_v26  ;;  %830 = vmatprep.subr.bf16.mxu0 %v950_v27 }
  0x4e   : > { %861 = vmatprep.subr.bf16.mxu1 %v1014_v6 }
  0x50   : > { %831 = vmatpush3.bf16.msra.mxu0 %v951_v29 }
  0x51   : > { %862 = vmatpush3.bf16.msra.mxu1 %v952_v30 }
  0x53   : > { %545 = vmatmul.mubr.bf16.vlgmr.msra.gmra.mrb[0].mxu0 %v953_v31 }
  0x54   : > { %864 = vmatmul.mubr.bf16.vlgmr.msra.gmra.mrb[0].mxu1 %v956_v32 }
 0x126   : > { %v832_v33 = vpop.f32.mrb[0].mxu0 }
 0x127   : > { %v587_v34 = vpop.f32.mrb[0].mxu1  ;;  %v833_v35 = vpop.f32.mrb[1].mxu0 }
 0x128   : > { %v834_v36 = vadd.f32 %v833_v35, %v832_v33  ;;  %v865_v37 = vpop.f32.mrb[1].mxu1  ;;  %v835_v38 = vpop.f32.mrb[2].mxu0 }
 0x129   : > { %v590_v40 = vpop.f32.mrb[2].mxu1  ;;  %v836_v41 = vpop.f32.mrb[3].mxu0 }
 0x12a   : > { %v588_v42 = vadd.f32 %v834_v36, %v587_v34  ;;  %v837_v43 = vadd.f32 %v836_v41, %v835_v38  ;;  %v866_v44 = vpop.f32.mrb[3].mxu1  ;;  %601 = sbr.rel (%p802_p13) target bundleno = 322 (0x142), region = 66 }
 0x12c   : > { %v594_v46 = vadd.f32 %v588_v42, %v298_v39  ;;  %v591_v47 = vadd.f32 %v837_v43, %v590_v40 }
 0x12e   : > { %596 = vst [vmem:[#allocation2] sm:$0xff] %v594_v46  ;;  %v595_v48 = vadd.f32 %v591_v47, %v299_v45 }
 0x130   : > { %597 = vst [vmem:[#allocation2 + $0x8] sm:$0xff] %v595_v48 }
 0x135   : > { %v602_v49 = vld [vmem:[#allocation2] sm:$0xff] }
 0x136   : > { %v609_v52 = vmul.f32 %v803_v51, %v602_v49 }
 0x137   : > { %v603_v50 = vld [vmem:[#allocation2 + $0x8] sm:$0xff] }
 0x138   : > { %v610_v53 = vmul.f32 %v803_v51, %v603_v50  ;;  %v616_v55 = vadd.f32 %v804_v54, %v609_v52 }
 0x13a   : > { %v617_v56 = vadd.f32 %v804_v54, %v610_v53  ;;  %vm618_vm1 = vcmp.gt.f32.partialorder %v616_v55, 0.0  ;;  %v620_v57 = vmul.f32 0.1, %v616_v55 }
 0x13c   : > { %vm619_vm2 = vcmp.gt.f32.partialorder %v617_v56, 0.0  ;;  %v621_v58 = vmul.f32 0.1, %v617_v56  ;;  %v622_v59 = vsel %vm618_vm1, %v616_v55, %v620_v57 }
 0x13e   : > { %v623_v60 = vsel %vm619_vm2, %v617_v56, %v621_v58 }
 0x13f   : > { %v814_v61 = vpack.c.bf16 %v623_v60, %v622_v59 }
 0x141   : > { %815 = vst [vmem:[%s1109_s30] sm:$0xff] %v814_v61  }
 0x142 PF: > { %s13_s18 = sadd.s32 1, %s1011_s18   ;;  %s1174_s12 = smov %s991_s13 }
 0x143   : > { %p10_p0 = scmp.ge.s32.totalorder %s13_s18, 8   ;;  %s1175_s13 = smov %s1087_s25 }
 0x144   : > { %s1176_s14 = smov %s1003_s16  ;;  %s1177_s15 = smov %s1007_s17 }
 0x145   : > { %s1178_s16 = smov %s1181_s19  ;;  %s1179_s17 = smov %s1185_s20 }
 0x146   :  { %12 = sbr.rel (!%p10_p0) target bundleno = 4 (0x4), region = 113 }

// kernel: _forward_impl.9
= control target key start
LH: loop header
LB: loop body
LE: loop exit
PB: predicated region body
PF: predicated region fallthrough
CT: control target
= control target key end

     0   :  { %s1740_s0 = inlined_call_operand.vmem [shape: bf16[32,5760], index: 0, kind: input, shape index: {}]   ;;  %s1741_s1 = inlined_call_operand.vmem [shape: bf16[5760,128], index: 1, kind: input, shape index: {}]   ;;  %s1742_s2 = inlined_call_operand.vmem [shape: f32[2,128], index: 2, kind: input, shape index: {}]   ;;  %s1743_s3 = inlined_call_operand.vmem [shape: bf16[128,128], index: 3, kind: input, shape index: {}]   ;;  %s1744_s4 = inlined_call_operand.vmem [shape: f32[2,128], index: 4, kind: input, shape index: {}]   ;;  %s1745_s5 = inlined_call_operand.hbm [shape: bf16[32,128], index: 5, kind: output, shape index: {0}]   ;;  %s1746_s6 = inlined_call_operand.hbm [shape: f32[32,128], index: 6, kind: output, shape index: {1}]  }
   0x1   :  { %1749 = sst [smem:[#allocation13_spill]] %s1740_s0 }
   0x2   :  { %1750 = sst [smem:[#allocation14_spill]] %s1741_s1 }
   0x3   :  { %12 = vsyncpa [#allocation5], 0 }
   0x4   :  { %14 = vsyncpa [#allocation5 + $0x1], 0 }
   0x5   :  { %15 = vsyncpa [#allocation7], 0 }
   0x6   :  { %17 = vsyncpa [#allocation7 + $0x1], 0  ;;  %s1453_s21 = smov 0   ;;  %s1455_s22 = smov 0  }
   0x7   :  { %s1457_s23 = smov 0   ;;  %s1459_s24 = smov 0  }
   0x8   :  { %s1461_s25 = smov 0   ;;  %s1463_s26 = smov 0  }
   0x9   :  { %s1465_s27 = smov 0   ;;  %s1467_s28 = smov 0  }
   0xa   :  { %s1469_s29 = smov 0   ;;  %s1471_s30 = smov 0  }
   0xb LB: > { %s968_s7 = sadd.s32 4294967295, %s1405_s30   ;;  %s969_s8 = sadd.s32 4294967294, %s1405_s30   ;;  %s1405_s30 = sphi %s1471_s30, %s23_s30   ;;  %s1401_s29 = sphi %s1469_s29, %s1770_s29   ;;  %s1397_s28 = sphi %s1467_s28, %s1769_s28   ;;  %s1393_s27 = sphi %s1465_s27, %s1768_s27   ;;  %s1389_s26 = sphi %s1463_s26, %s1767_s26   ;;  %s1385_s25 = sphi %s1461_s25, %s1766_s25   ;;  %s1381_s24 = sphi %s1459_s24, %s1765_s24   ;;  %s1377_s23 = sphi %s1457_s23, %s1764_s23   ;;  %s1373_s22 = sphi %s1455_s22, %s1763_s22   ;;  %s1369_s21 = sphi %s1453_s21, %s1762_s21  }
   0xc   : > { %s32_s9 = sadd.s32 1, %s1397_s28  ;;  %s35_s10 = sadd.s32 1, %s1401_s29 }
   0xd   : > { %p33_p0 = scmp.ge.s32.totalorder %s32_s9, 15  ;;  %s44_s11 = sadd.s32 1, %s1385_s25 }
   0xe   : > { %p51_p1 = scmp.ne.s32.totalorder %s1385_s25, %s1381_s24  ;;  %p52_p2 = scmp.eq.s32.totalorder %s1405_s30, 0 }
   0xf   : > { %s1772_s9 = smov (%p33_p0, %s32_s9), 0  ;;  %s1774_s10 = smov (!%p33_p0, %s35_s10), %s1401_s29 }
  0x10   : > { %1751 = sst [smem:[#allocation10_spill]] %s1772_s9  ;;  %s40_s12 = ssub.s32 %s1397_s28, %s1772_s9 }
  0x11   : > { %p1516_p3 = por %p52_p2, %p51_p1  ;;  %p37_p4 = scmp.ge.s32.totalorder %s1774_s10, 2 }
  0x12   : > { %s159_s14 = sadd.s32 1, %s1377_s23  ;;  %p169_p5 = scmp.ne.s32.totalorder %s1377_s23, %s1373_s22 }
  0x13   : > { %p170_p6 = scmp.eq.s32.totalorder %s968_s7, 29  ;;  %s1776_s10 = smov (%p37_p4, %s1774_s10), 0 }
  0x14   : > { %1753 = sst [smem:[#allocation11_spill]] %s1776_s10  ;;  %p175_p8 = scmp.ne.s32.totalorder %s1373_s22, %s1369_s21 }
  0x15   : > { %p1525_p7 = por %p170_p6, %p169_p5  ;;  %s39_s16 = ssub.s32 %s1401_s29, %s1776_s10 }
  0x16   : > { %p176_p9 = scmp.eq.s32.totalorder %s969_s8, 29  ;;  %s41_s17 = sor.u32 %s40_s12, %s39_s16 }
  0x17   : > { %p157_p10 = scmp.eq.s32.totalorder %s39_s16, 0  ;;  %p42_p11 = scmp.eq.s32.totalorder %s41_s17, 0 }
  0x18   : > { %p1533_p12 = por %p176_p9, %p175_p8  ;;  %p971_p13 = scmp.ge.s32.totalorder %s1405_s30, 30 }
  0x19   : > { %s1538_s19 = scalar_select %p157_p10, %s1377_s23, %s159_s14  }
  0x1a   : > { %s1541_s20 = scalar_select %p42_p11, %s1385_s25, %s44_s11  }
  0x1b   : > { %227 = sbr.rel (%p971_p13) target bundleno = 45 (0x2d), region = 28 }
  0x1c   : > { %1756 = sst [smem:[#allocation12_spill]] %s1541_s20 }
  0x22   : > { %230 = sbr.rel (!%p1516_p3) target bundleno = 45 (0x2d), region = 32  ;;  %s232_s7 = sand.u32 (%p1516_p3), 1, %s1385_s25  }
  0x23   : > { %s236_s8 = smul.u32 (%p1516_p3), 3, %s1397_s28  ;;  %s1757_s0 = sld [smem:[#allocation13_spill]] (%p1516_p3) }
  0x24   : > { %s1123_s12 = smul.u32 (%p1516_p3), 24, %s232_s7 }
  0x25   : > { %s1124_s16 = smul.u32 (%p1516_p3), 90, %s1401_s29 }
  0x26   : > { %s234_s20 = scalar_lea.vmem (%p1516_p3), [#allocation3], %s1123_s12 }
  0x27   : > { %s238_s17 = sadd.s32 (%p1516_p3), %s1124_s16, %s236_s8 }
  0x28   : > { %s974_s10 = sshll.u32 (%p1516_p3), %s238_s17, 2 }
  0x29   : > { %s240_s11 = scalar_lea.vmem %s1757_s0, %s974_s10 }
  0x2a   : > { %v255_v0 = vld [vmem:[%s240_s11] sm:$0xff]  ;;  %v257_v1 = vld [vmem:[%s240_s11 + $0xb4] sm:$0xff]  ;;  %v975_v2 = vld [vmem:[%s240_s11 + $0x8] sm:$0xf] }
  0x2b   : > { %256 = vst [vmem:[%s234_s20] sm:$0xff] %v255_v0  ;;  %258 = vst [vmem:[%s234_s20 + $0xc] sm:$0xff] %v257_v1  ;;  %v977_v3 = vld [vmem:[%s240_s11 + $0xbc] sm:$0xf] }
  0x2c   : > { %976 = vst [vmem:[%s234_s20 + $0x8] sm:$0xf] %v975_v2  ;;  %978 = vst [vmem:[%s234_s20 + $0x14] sm:$0xf] %v977_v3 }
  0x2d PF: > { %p979_p0 = scmp.ge.s32.totalorder %s1405_s30, 1  ;;  %p283_p1 = scmp.lt.s32.totalorder %s1405_s30, 31 }
  0x2f   : > { %p284_p2 = pnand %p979_p0, %p283_p1 }
  0x30   : > { %s290_s9 = sand.u32 (!%p284_p2), 1, %s1381_s24   ;;  %s1556_s10 = sand.u32 (!%p284_p2), 1, %s1373_s22  }
  0x31   : > { %287 = sbr.rel (%p284_p2) target bundleno = 603 (0x25b), region = 62  ;;  %s980_s7 = sshll.u32 (!%p284_p2), %s1556_s10, 3 }
  0x32   : > { %s1125_s13 = smul.u32 (!%p284_p2), 24, %s290_s9  ;;  %s981_s8 = sshll.u32 (!%p284_p2), %s1556_s10, 4 }
  0x33   : > { %s331_s20 = smul.u32 (!%p284_p2), 48, %s1389_s26  ;;  %s1758_s1 = sld [smem:[#allocation14_spill]] (!%p284_p2) }
  0x34   : > { %s1566_s11 = scalar_lea.vmem (!%p284_p2), [#allocation3], %s1125_s13  ;;  %s1568_s0 = scalar_lea.vmem (!%p284_p2), [#allocation4], %s980_s7 }
  0x35   : > { %p332_p3 = scmp.lt.s32.totalorder (!%p284_p2), %s331_s20, 719  ;;  %s1570_s24 = scalar_lea.vmem (!%p284_p2), [#allocation6], %s981_s8 }
  0x36   : > { %p983_p4 = scmp.ne.s32.totalorder (!%p284_p2), %s1389_s26, 0 }
  0x38   : > { %s1778_s20 = smov (!%p332_p3, %s331_s20), 719  ;;  %343 = sbr.rel (%p983_p4) target bundleno = 63 (0x3f), region = 70 }
  0x39   : > { %s982_s12 = sshll.u32 %s1778_s20, 2  ;;  %v1407_v4 = vmov (!%p983_p4), 0.0  }
  0x3a   : > { %s1564_s14 = scalar_lea.vmem %s1758_s1, %s982_s12  ;;  %344 = vst [vmem:[#allocation2] sm:$0xff] (!%p983_p4), %v1407_v4  ;;  %345 = vst [vmem:[#allocation2 + $0x8] sm:$0xff] (!%p983_p4), %v1407_v4 }
  0x3f PF: > { %v1227_v5 = vld [vmem:[%s1564_s14 + $0x40] sm:$0xff]   ;;  %v1408_v6 = vmov 0.0   ;;  %vm1409_vm0 = vmmov 0   ;;  %v1230_v9 = vld [vmem:[%s1564_s14 + $0x48] sm:$0xff]   ;;  %v1233_v12 = vld [vmem:[%s1564_s14 + $0x50] sm:$0xff]   ;;  %p1011_p5 = scmp.ne.s32.totalorder %s1389_s26, 14 }
  0x40   : > { %1083 = vmatprep.subr.bf16.mxu1 %v1408_v6  ;;  %v1228_v7 = vld [vmem:[%s1564_s14] sm:$0xff]   ;;  %1043 = vmatprep.subr.bf16.mxu0 %v1227_v5  ;;  %v1231_v10 = vld [vmem:[%s1564_s14 + $0x8] sm:$0xff]   ;;  %v1234_v13 = vld [vmem:[%s1564_s14 + $0x10] sm:$0xff]   ;;  %v1410_v50 = vmov (!%p1011_p5), 0.0   ;;  %vm1411_vm1 = vmmov (!%p1011_p5), 0  }
  0x41   : > { %v1229_v8 = vld [vmem:[%s1564_s14 + $0x80] sm:$0xff]   ;;  %1099 = vmatprep.mubr.msk.bf16.mxu1 %vm1409_vm0, %v1408_v6  ;;  %1044 = vmatpush3.bf16.msra.mxu0 %v1228_v7  ;;  %v1232_v11 = vld [vmem:[%s1564_s14 + $0x88] sm:$0xff]   ;;  %v1235_v14 = vld [vmem:[%s1564_s14 + $0x90] sm:$0xff]  }
  0x42   : > { %1084 = vmatpush3.bf16.msra.mxu1 %v1229_v8  ;;  %1045 = vmatprep.subr.bf16.mxu0 %v1230_v9  ;;  %v1236_v15 = vld [vmem:[%s1564_s14 + $0x58] sm:$0xff]   ;;  %v1239_v18 = vld [vmem:[%s1564_s14 + $0x60] sm:$0xff]   ;;  %v1242_v21 = vld [vmem:[%s1564_s14 + $0x68] sm:$0xff]  }
  0x43   : > { %1085 = vmatprep.subr.bf16.mxu1 %v1408_v6  ;;  %v1237_v16 = vld [vmem:[%s1564_s14 + $0x18] sm:$0xff]   ;;  %v1240_v19 = vld [vmem:[%s1564_s14 + $0x20] sm:$0xff]   ;;  %v1243_v22 = vld [vmem:[%s1564_s14 + $0x28] sm:$0xff]  }
  0x44   : > { %v1238_v17 = vld [vmem:[%s1564_s14 + $0x98] sm:$0xff]   ;;  %v1241_v20 = vld [vmem:[%s1564_s14 + $0xa0] sm:$0xff]   ;;  %v1244_v23 = vld [vmem:[%s1564_s14 + $0xa8] sm:$0xff]  }
  0x45   : > { %1046 = vmatpush3.bf16.msra.mxu0 %v1231_v10  ;;  %v1245_v24 = vld [vmem:[%s1564_s14 + $0x70] sm:$0xff]   ;;  %v1248_v27 = vld [vmem:[%s1564_s14 + $0x78] sm:$0xff]   ;;  %v346_v39 = vld [vmem:[#allocation2] sm:$0xff] }
  0x46   : > { %1086 = vmatpush3.bf16.msra.mxu1 %v1232_v11  ;;  %1047 = vmatprep.subr.bf16.mxu0 %v1233_v12  ;;  %v1246_v25 = vld [vmem:[%s1564_s14 + $0x30] sm:$0xff]   ;;  %v1249_v29 = vld [vmem:[%s1564_s14 + $0x38] sm:$0xff]   ;;  %v347_v45 = vld [vmem:[#allocation2 + $0x8] sm:$0xff] }
  0x47   : > { %1087 = vmatprep.subr.bf16.mxu1 %v1408_v6  ;;  %v1247_v26 = vld [vmem:[%s1564_s14 + $0xb0] sm:$0xff]   ;;  %v1250_v30 = vld [vmem:[%s1564_s14 + $0xb8] sm:$0xff]   ;;  %v1255_v49 = vld [vmem:[%s1743_s3] sm:$0xff] (!%p1011_p5)  }
  0x48   : > { %v1253_v28 = vld [vmem:[%s1566_s11 + $0x4] ss:$12 sps:$4 sm:$0xff]   ;;  %v1251_v31 = vld [vmem:[%s1566_s11] ss:$12 sps:$4 sm:$0xff]   ;;  %v1254_v32 = vld [vmem:[%s1566_s11 + $0x8] ss:$12 sps:$4 sm:$0xff]  }
  0x49   : > { %1048 = vmatpush3.bf16.msra.mxu0 %v1234_v13  ;;  %592 = vmatprep.mubr.bf16.mxu0 %v1253_v28  ;;  %v1256_v51 = vld [vmem:[%s1743_s3 + $0x8] sm:$0xff] (!%p1011_p5)   ;;  %v1257_v52 = vld [vmem:[%s1743_s3 + $0x10] sm:$0xff] (!%p1011_p5)   ;;  %v1012_v55 = vld [vmem:[%s1742_s2] ss:$0 sm:$0xff] (!%p1011_p5) }
  0x4a   : > { %1088 = vmatpush3.bf16.msra.mxu1 %v1235_v14  ;;  %1049 = vmatprep.subr.bf16.mxu0 %v1236_v15  ;;  %v1013_v58 = vld [vmem:[%s1742_s2 + $0x1] ss:$0 sm:$0xff] (!%p1011_p5)  ;;  %v1258_v59 = vld [vmem:[%s1743_s3 + $0x18] sm:$0xff] (!%p1011_p5)   ;;  %v1260_v4 = vld [vmem:[%s1743_s3 + $0x28] sm:$0xff] (!%p1011_p5)  }
  0x4b   : > { %1089 = vmatprep.subr.bf16.mxu1 %v1408_v6  ;;  %v1259_v0 = vld [vmem:[%s1743_s3 + $0x20] sm:$0xff] (!%p1011_p5)   ;;  %v1261_v5 = vld [vmem:[%s1743_s3 + $0x30] sm:$0xff] (!%p1011_p5)  }
  0x4c   : > { %v1024_v7 = vld [vmem:[%s1744_s4] ss:$0 sm:$0xff] (!%p1011_p5)  ;;  %v1025_v9 = vld [vmem:[%s1744_s4 + $0x1] ss:$0 sm:$0xff] (!%p1011_p5) }
  0x4d   : > { %1050 = vmatpush3.bf16.msra.mxu0 %v1237_v16 }
  0x4e   : > { %1090 = vmatpush3.bf16.msra.mxu1 %v1238_v17  ;;  %1051 = vmatprep.subr.bf16.mxu0 %v1239_v18 }
  0x4f   : > { %1091 = vmatprep.subr.bf16.mxu1 %v1408_v6 }
  0x51   : > { %1052 = vmatpush3.bf16.msra.mxu0 %v1240_v19 }
  0x52   : > { %1092 = vmatpush3.bf16.msra.mxu1 %v1241_v20  ;;  %1053 = vmatprep.subr.bf16.mxu0 %v1242_v21 }
  0x53   : > { %1093 = vmatprep.subr.bf16.mxu1 %v1408_v6 }
  0x55   : > { %1054 = vmatpush3.bf16.msra.mxu0 %v1243_v22 }
  0x56   : > { %1094 = vmatpush3.bf16.msra.mxu1 %v1244_v23  ;;  %1055 = vmatprep.subr.bf16.mxu0 %v1245_v24 }
  0x57   : > { %1095 = vmatprep.subr.bf16.mxu1 %v1408_v6 }
  0x59   : > { %1056 = vmatpush3.bf16.msra.mxu0 %v1246_v25 }
  0x5a   : > { %1096 = vmatpush3.bf16.msra.mxu1 %v1247_v26  ;;  %1057 = vmatprep.subr.bf16.mxu0 %v1248_v27 }
  0x5b   : > { %1097 = vmatprep.subr.bf16.mxu1 %v1408_v6  ;;  %v1262_v6 = vld [vmem:[%s1743_s3 + $0x38] sm:$0xff] (!%p1011_p5)  }
  0x5d   : > { %1058 = vmatpush3.bf16.msra.mxu0 %v1249_v29 }
  0x5e   : > { %1098 = vmatpush3.bf16.msra.mxu1 %v1250_v30  ;;  %1103 = vmatprep.subr.bf16.mxu0 (!%p1011_p5), %v1410_v50 }
  0x60   : > { %593 = vmatmul.mubr.bf16.vlgmr.msra.gmra.mrb[0].mxu0 %v1251_v31 }
  0x61   : > { %1100 = vmatmul.mubr.bf16.vlgmr.msra.gmra.mrb[0].mxu1 %v1254_v32  ;;  %1104 = vmatpush3.bf16.msra.mxu0 (!%p1011_p5), %v1255_v49 }
  0x62   : > { %1119 = vmatprep.mubr.msk.bf16.mxu0 (!%p1011_p5), %vm1411_vm1, %v1410_v50  ;;  %1105 = vmatprep.subr.bf16.mxu0 (!%p1011_p5), %v1410_v50 }
  0x65   : > { %1106 = vmatpush3.bf16.msra.mxu0 (!%p1011_p5), %v1256_v51 }
  0x66   : > { %1107 = vmatprep.subr.bf16.mxu0 (!%p1011_p5), %v1410_v50 }
  0x69   : > { %1108 = vmatpush3.bf16.msra.mxu0 (!%p1011_p5), %v1257_v52 }
  0x6a   : > { %1109 = vmatprep.subr.bf16.mxu0 (!%p1011_p5), %v1410_v50 }
  0x6d   : > { %1110 = vmatpush3.bf16.msra.mxu0 (!%p1011_p5), %v1258_v59 }
  0x6e   : > { %1111 = vmatprep.subr.bf16.mxu0 (!%p1011_p5), %v1410_v50 }
  0x71   : > { %1112 = vmatpush3.bf16.msra.mxu0 (!%p1011_p5), %v1259_v0 }
  0x72   : > { %1113 = vmatprep.subr.bf16.mxu0 (!%p1011_p5), %v1410_v50 }
  0x75   : > { %1114 = vmatpush3.bf16.msra.mxu0 (!%p1011_p5), %v1260_v4 }
  0x76   : > { %1115 = vmatprep.subr.bf16.mxu0 (!%p1011_p5), %v1410_v50 }
  0x79   : > { %1116 = vmatpush3.bf16.msra.mxu0 (!%p1011_p5), %v1261_v5 }
  0x7a   : > { %1117 = vmatprep.subr.bf16.mxu0 (!%p1011_p5), %v1410_v50 }
  0x7d   : > { %1118 = vmatpush3.bf16.msra.mxu0 (!%p1011_p5), %v1262_v6 }
 0x133   : > { %v1059_v33 = vpop.f32.mrb[0].mxu0 }
 0x134   : > { %v635_v34 = vpop.f32.mrb[0].mxu1  ;;  %v1060_v35 = vpop.f32.mrb[1].mxu0 }
 0x135   : > { %v1061_v36 = vadd.f32 %v1060_v35, %v1059_v33  ;;  %v1101_v37 = vpop.f32.mrb[1].mxu1  ;;  %v1062_v38 = vpop.f32.mrb[2].mxu0 }
 0x136   : > { %v638_v40 = vpop.f32.mrb[2].mxu1  ;;  %v1063_v41 = vpop.f32.mrb[3].mxu0 }
 0x137   : > { %v636_v42 = vadd.f32 %v1061_v36, %v635_v34  ;;  %v1064_v43 = vadd.f32 %v1063_v41, %v1062_v38  ;;  %v1102_v44 = vpop.f32.mrb[3].mxu1  ;;  %649 = sbr.rel (%p1011_p5) target bundleno = 553 (0x229), region = 74 }
 0x139   : > { %v642_v46 = vadd.f32 %v636_v42, %v346_v39  ;;  %v639_v47 = vadd.f32 %v1064_v43, %v638_v40 }
 0x13b   : > { %644 = vst [vmem:[#allocation2] sm:$0xff] %v642_v46  ;;  %v643_v48 = vadd.f32 %v639_v47, %v347_v45 }
 0x13d   : > { %645 = vst [vmem:[#allocation2 + $0x8] sm:$0xff] %v643_v48 }
 0x142   : > { %v650_v53 = vld [vmem:[#allocation2] sm:$0xff] }
 0x143   : > { %v657_v56 = vmul.f32 %v1012_v55, %v650_v53 }
 0x144   : > { %v651_v54 = vld [vmem:[#allocation2 + $0x8] sm:$0xff] }
 0x145   : > { %v658_v57 = vmul.f32 %v1012_v55, %v651_v54  ;;  %v664_v60 = vadd.f32 %v1013_v58, %v657_v56 }
 0x147   : > { %v665_v61 = vadd.f32 %v1013_v58, %v658_v57  ;;  %vm666_vm2 = vcmp.gt.f32.partialorder %v664_v60, 0.0  ;;  %v668_v62 = vmul.f32 0.1, %v664_v60 }
 0x149   : > { %vm667_vm3 = vcmp.gt.f32.partialorder %v665_v61, 0.0  ;;  %v669_v63 = vmul.f32 0.1, %v665_v61  ;;  %v670_v1 = vsel %vm666_vm2, %v664_v60, %v668_v62 }
 0x14b   : > { %v671_v2 = vsel %vm667_vm3, %v665_v61, %v669_v63 }
 0x14c   : > { %v672_v3 = vpack.c.bf16 %v671_v2, %v670_v1 }
 0x14e   : > { %1042 = vst [vmem:[%s1568_s0] sm:$0xff] %v672_v3   ;;  %1120 = vmatmul.mubr.bf16.vlgmr.msra.gmra.mrb[0].mxu0 %v672_v3 }
 0x221   : > { %v780_v8 = vpop.f32.mrb[0].mxu0 }
 0x222   : > { %v792_v10 = vmul.f32 %v1024_v7, %v780_v8  ;;  %v1121_v11 = vpop.f32.mrb[1].mxu0 }
 0x223   : > { %v783_v12 = vpop.f32.mrb[2].mxu0 }
 0x224   : > { %v799_v13 = vadd.f32 %v1025_v9, %v792_v10  ;;  %v793_v14 = vmul.f32 %v1024_v7, %v783_v12  ;;  %v1122_v15 = vpop.f32.mrb[3].mxu0 }
 0x226   : > { %801 = vst [vmem:[%s1570_s24] sm:$0xff] %v799_v13  ;;  %v800_v16 = vadd.f32 %v1025_v9, %v793_v14 }
 0x228   : > { %802 = vst [vmem:[%s1570_s24 + $0x8] sm:$0xff] %v800_v16 }
 0x229 PF: > { %s1036_s7 = sshll.u32 %s1393_s27, 7  ;;  %s822_s26 = sshll.u32 %s1568_s0, 4  ;;  %s1647_s26 = int_to_ptr.vmem [resolvable:$true] %s822_s26 }
 0x22a   : > { %s1644_s12 = scalar_lea.hbm %s1745_s5, %s1036_s7  ;;  %s804_s16 = scalar_lea.sflag [#allocation5], %s1556_s10 }
 0x22b   : > { %s1263_s17 = scalar_lea.vmem %s1647_s26, 128  ;;  %s1412_s14 = smov [#allocation4]  }
 0x22c   : > { %p1264_p6 = scmp.ne.s32.totalorder %s1647_s26, %s1263_s17  ;;  %s1267_s11 = sshll.u32 %s1412_s14, 4  ;;  %s1268_s11 = int_to_ptr.vmem [resolvable:$false] %s1267_s11 }
 0x22d   : > { %s1269_s9 = scalar_lea.vmem %s1268_s11, 256  ;;  %p1270_p10 = scmp.lt.s32.totalorder %s1647_s26, %s1268_s11 }
 0x22e   : > { %p1265_p8 = pnand %p1264_p6, %p1525_p7  ;;  %p1271_p11 = scmp.lt.s32.totalorder %s1269_s9, %s1263_s17 }
 0x230   : > { %p1266_p9 = pneg %p1265_p8  ;;  %p1272_p13 = por %p1271_p11, %p1270_p10 }
 0x232   : > { %p1273_p0 = pnand %p1272_p13, %p1266_p9 }
 0x234   : > { %1276 = shalt.err (!%p1273_p0)
}
 0x235   : > { %s1277_s0 = scalar_lea.hbm %s1644_s12, 128  ;;  %s1281_s8 = scalar_lea.hbm %s1745_s5, 256 }
 0x236   : > { %p1278_p1 = scmp.ne.s32.totalorder %s1644_s12, %s1277_s0  ;;  %p1282_p4 = scmp.lt.u32.totalorder %s1644_s12, %s1745_s5 }
 0x237   : > { %p1283_p5 = scmp.lt.u32.totalorder %s1281_s8, %s1277_s0  ;;  %p1285_p8 = scmp.lt.u32.totalorder %s1277_s0, %s1644_s12 }
 0x238   : > { %p1279_p2 = pnand %p1278_p1, %p1525_p7 }
 0x239   : > { %p1284_p6 = por %p1283_p5, %p1282_p4 }
 0x23a   : > { %p1280_p3 = pneg %p1279_p2 }
 0x23b   : > { %p1286_p9 = por %p1285_p8, %p1284_p6 }
 0x23d   : > { %p1287_p10 = pnand %p1286_p9, %p1280_p3 }
 0x23f   : > { %1290 = shalt.err (!%p1287_p10)
}
 0x240   : > { %s1413_s17 = smov 64   ;;  %s1414_s11 = smov 4  }
 0x241   : > { %1126 = dma.vmem_to_hbm [thread:$0]  (%p1525_p7), %s1647_s26, 128, %s1644_s12, %s804_s16, %s1413_s17, %s1413_s17, %s1414_s11  }
 0x242   : > { %s1037_s9 = sshll.u32 %s1393_s27, 8  ;;  %s838_s13 = sshll.u32 %s1570_s24, 4  ;;  %s1680_s13 = int_to_ptr.vmem [resolvable:$true] %s838_s13 }
 0x243   : > { %s1678_s8 = scalar_lea.hbm %s1746_s6, %s1037_s9  ;;  %s809_s20 = scalar_lea.sflag [#allocation7], %s1556_s10 }
 0x244   : > { %s1291_s14 = scalar_lea.vmem %s1680_s13, 256  ;;  %s1415_s1 = smov [#allocation6]  }
 0x245   : > { %p1292_p11 = scmp.ne.s32.totalorder %s1680_s13, %s1291_s14  ;;  %s1295_s12 = sshll.u32 %s1415_s1, 4  ;;  %s1296_s12 = int_to_ptr.vmem [resolvable:$false] %s1295_s12 }
 0x246   : > { %s1297_s27 = scalar_lea.vmem %s1296_s12, 512  ;;  %p1298_p1 = scmp.lt.s32.totalorder %s1680_s13, %s1296_s12 }
 0x247   : > { %p1293_p13 = pnand %p1292_p11, %p1525_p7  ;;  %p1299_p2 = scmp.lt.s32.totalorder %s1297_s27, %s1291_s14 }
 0x249   : > { %p1294_p0 = pneg %p1293_p13  ;;  %p1300_p3 = por %p1299_p2, %p1298_p1 }
 0x24b   : > { %p1301_p4 = pnand %p1300_p3, %p1294_p0 }
 0x24d   : > { %1304 = shalt.err (!%p1301_p4)
}
 0x24e   : > { %s1305_s24 = scalar_lea.hbm %s1678_s8, 256  ;;  %s1309_s1 = scalar_lea.hbm %s1746_s6, 512 }
 0x24f   : > { %p1306_p5 = scmp.ne.s32.totalorder %s1678_s8, %s1305_s24  ;;  %p1310_p9 = scmp.lt.u32.totalorder %s1678_s8, %s1746_s6 }
 0x250   : > { %p1311_p10 = scmp.lt.u32.totalorder %s1309_s1, %s1305_s24  ;;  %p1313_p13 = scmp.lt.u32.totalorder %s1305_s24, %s1678_s8 }
 0x251   : > { %p1307_p6 = pnand %p1306_p5, %p1525_p7 }
 0x252   : > { %p1312_p11 = por %p1311_p10, %p1310_p9 }
 0x253   : > { %p1308_p8 = pneg %p1307_p6 }
 0x254   : > { %p1314_p0 = por %p1313_p13, %p1312_p11 }
 0x256   : > { %p1315_p1 = pnand %p1314_p0, %p1308_p8 }
 0x258   : > { %1318 = shalt.err (!%p1315_p1)
}
 0x259   : > { %s1416_s9 = smov 128   ;;  %s1417_s7 = smov 8  }
 0x25a   : > { %1127 = dma.vmem_to_hbm [thread:$0]  (%p1525_p7), %s1680_s13, 256, %s1678_s8, %s809_s20, %s1416_s9, %s1416_s9, %s1417_s7  }
 0x25b PF: > { %p1137_p2 = scmp.ge.s32.totalorder %s1405_s30, 2  ;;  %s853_s0 = sand.u32 1, %s1369_s21  }
 0x25c   : > { %s854_s14 = scalar_lea.sflag [#allocation5], %s853_s0 }
 0x25d   : > { %p1131_p3 = pnand %p1137_p2, %p1533_p12 }
 0x25f   : > { %1360 = dma.done.wait (!%p1131_p3), %s854_s14, 128  }
 0x260   : > { %1362 = vsyncadd (!%p1131_p3), %s854_s14, 4294967168  ;;  %s863_s12 = scalar_lea.sflag [#allocation7], %s853_s0 }
 0x261   : > { %1364 = dma.done.wait (!%p1131_p3), %s863_s12, 256  }
 0x262   : > { %1366 = vsyncadd (!%p1131_p3), %s863_s12, 4294967040  ;;  %s23_s30 = sadd.s32 1, %s1405_s30   ;;  %s1759_s15 = sld [smem:[#allocation12_spill]] }
 0x263   : > { %p20_p4 = scmp.ge.s32.totalorder %s23_s30, 32   ;;  %s1760_s10 = sld [smem:[#allocation10_spill]] }
 0x264   : > { %s1761_s13 = sld [smem:[#allocation11_spill]]  ;;  %s1762_s21 = smov %s1373_s22 }
 0x265   : > { %s1763_s22 = smov %s1377_s23  ;;  %s1764_s23 = smov %s1538_s19 }
 0x266   : > { %s1765_s24 = smov %s1385_s25  ;;  %s1767_s26 = smov %s1397_s28 }
 0x267   : > { %s1768_s27 = smov %s1401_s29  ;;  %22 = sbr.rel (!%p20_p4) target bundleno = 11 (0xb), region = 140 }
 0x268   : > { %s1766_s25 = smov %s1759_s15 }
 0x269   : > { %s1769_s28 = smov %s1760_s10 }
 0x26a   : > { %s1770_s29 = smov %s1761_s13 }
 0x26e   :  { %868 = vsyncpa [#allocation5], 1 }
 0x26f   :  { %870 = vsyncpa [#allocation5 + $0x1], 1 }
 0x270   :  { %871 = vsyncpa [#allocation7], 1 }
 0x271   :  { %873 = vsyncpa [#allocation7 + $0x1], 1 }

</bundles_post_ra>
